<compile_context>
chip_gen: v7x
topology: tpu7x:2x2x1
jax: 0.10.0
libtpu: 0.0.40
codegen_flags: <defaults>
</compile_context>

<pallas_src>
import math
import functools

import jax
import jax.numpy as jnp
from jax.experimental import pallas as pl
from jax.experimental.pallas import tpu as pltpu


# ----------------------------------------------------------------------------- helpers

def _layer_norm(x, gamma, beta, eps=1e-5):
    mu = jnp.mean(x, axis=-1, keepdims=True)
    var = jnp.mean((x - mu) ** 2, axis=-1, keepdims=True)
    return (x - mu) * jax.lax.rsqrt(var + eps) * gamma + beta


def _gelu_exact(x):
    # matches torch.nn.functional.gelu (erf-based, non-approximate)
    return 0.5 * x * (1.0 + jax.lax.erf(x / jnp.sqrt(jnp.float32(2.0))))


def _row_tile(m, cap=512):
    for t in (512, 256, 128, 64, 32, 16, 8):
        if t <= cap and m % t == 0:
            return t
    return m


def _pick_tile_b(batch, seq, dim, budget_bytes=4 << 20):
    for cand in range(batch, 0, -1):
        if batch % cand == 0 and cand * seq * dim * 4 <= budget_bytes:
            return cand
    return 1


# ----------------------------------------------------------------- fused decoder kernel

def decoder_layer_kernel(x_ref,
                         wqkv_ref, bqkv_ref, wo_ref, bo_ref,
                         g1_ref, be1_ref,
                         w1_ref, b1_ref, w2_ref, b2_ref,
                         g2_ref, be2_ref,
                         o_ref,
                         x_sc, ctx_sc,
                         *, num_heads, tile_B, T):
    l = pl.program_id(1)

    # First layer of this batch tile: pull the embedded input into the resident activation.
    @pl.when(l == 0)
    def _():
        x_sc[...] = x_ref[...]

    x = x_sc[...]                                    # (TM, D) f32, TM = tile_B * T
    TM, D = x.shape
    H = num_heads
    dh = D // H
    scale = jnp.float32(1.0 / math.sqrt(dh))

    x_b16 = x.astype(jnp.bfloat16)

    # ---- fused QKV projection: one bf16 MXU matmul, f32 accumulation ----
    qkv = jnp.dot(x_b16, wqkv_ref[...], preferred_element_type=jnp.float32) + bqkv_ref[...]
    q = qkv[:, 0 * D:1 * D]
    k = qkv[:, 1 * D:2 * D]
    v = qkv[:, 2 * D:3 * D]

    # ---- causal mask generated in-kernel (row >= col) ----
    row = jax.lax.broadcasted_iota(jnp.int32, (T, T), 0)
    col = jax.lax.broadcasted_iota(jnp.int32, (T, T), 1)
    causal = row >= col                              # (T, T) bool

    # ---- attention: scores/softmax per head (batched over B), context written into a
    #      VMEM slab so the output projection is ONE full-K matmul ----
    for h in range(H):                               # static unroll, H small
        sl = slice(h * dh, (h + 1) * dh)
        qh = q[:, sl].reshape(tile_B, T, dh).astype(jnp.bfloat16)
        kh = k[:, sl].reshape(tile_B, T, dh).astype(jnp.bfloat16)
        vh = v[:, sl].reshape(tile_B, T, dh).astype(jnp.bfloat16)
        s = jnp.einsum('bqd,bkd->bqk', qh, kh,
                       preferred_element_type=jnp.float32) * scale       # (B, T, T)
        s = jnp.where(causal[None], s, jnp.float32(-1e9))
        s = s - jnp.max(s, axis=-1, keepdims=True)
        p = jnp.exp(s)
        p = p * pl.reciprocal(jnp.sum(p, axis=-1, keepdims=True), approx=False)
        ctx = jnp.einsum('bqk,bkd->bqd', p.astype(jnp.bfloat16), vh,
                         preferred_element_type=jnp.float32)             # (B, T, dh)
        ctx_sc[:, sl] = ctx.reshape(TM, dh)

    attn = jnp.dot(ctx_sc[...].astype(jnp.bfloat16), wo_ref[...],
                   preferred_element_type=jnp.float32) + bo_ref[...]

    # ---- post-LN residual blocks (f32 elementwise math) ----
    h1 = _layer_norm(attn + x, g1_ref[...], be1_ref[...])

    ff = jnp.dot(h1.astype(jnp.bfloat16), w1_ref[...],
                 preferred_element_type=jnp.float32) + b1_ref[...]
    ff = _gelu_exact(ff)
    ff = jnp.dot(ff.astype(jnp.bfloat16), w2_ref[...],
                 preferred_element_type=jnp.float32) + b2_ref[...]
    out = _layer_norm(ff + h1, g2_ref[...], be2_ref[...])

    x_sc[...] = out                                  # stays resident for the next layer

    @pl.when(l == pl.num_programs(1) - 1)
    def _():
        o_ref[...] = out


def run_decoder(x, layers, num_heads, B, T, tile_B):
    """x: (B*T, D) f32; layers: dict of stacked (L, ...) params (weights bf16)."""
    M, D = x.shape
    L = layers["wqkv"].shape[0]
    ff_dim = layers["w1"].shape[2]
    TM = tile_B * T
    n_btiles = B // tile_B

    def per_layer_spec(shape):
        n = len(shape)
        return pl.BlockSpec((pl.Squeezed(),) + shape,
                            lambda b, l, _n=n: (l,) + (0,) * _n)

    act_in_spec = pl.BlockSpec((TM, D), lambda b, l: (b, 0))
    act_out_spec = pl.BlockSpec((TM, D), lambda b, l: (b, 0))

    in_specs = [
        act_in_spec,                                               # x (streamed per tile)
        per_layer_spec((D, 3 * D)), per_layer_spec((1, 3 * D)),    # wqkv, bqkv
        per_layer_spec((D, D)), per_layer_spec((1, D)),            # wo, bo
        per_layer_spec((1, D)), per_layer_spec((1, D)),            # ln1 gamma, beta
        per_layer_spec((D, ff_dim)), per_layer_spec((1, ff_dim)),  # w1, b1
        per_layer_spec((ff_dim, D)), per_layer_spec((1, D)),       # w2, b2
        per_layer_spec((1, D)), per_layer_spec((1, D)),            # ln2 gamma, beta
    ]

    # Explicit VMEM budget: 2x double-buffered per-layer weight set (bf16) + f32 biases/LN,
    # plus streamed input tile, output tile, and the two (TM, D) scratch slabs, + headroom.
    w_bytes = 2 * (D * 3 * D + D * D + D * ff_dim + ff_dim * D)
    w_bytes += 4 * (3 * D + D + ff_dim + D + 4 * D)
    resident = 2 * w_bytes + 2 * TM * D * 4 + 2 * TM * D * 4 + 2 * TM * D * 4
    vmem_limit = int(max(32 << 20, min(2 * resident + (8 << 20), 100 << 20)))

    kernel = functools.partial(decoder_layer_kernel,
                               num_heads=num_heads, tile_B=tile_B, T=T)

    return pl.pallas_call(
        kernel,
        out_shape=jax.ShapeDtypeStruct((M, D), jnp.float32),
        grid=(n_btiles, L),
        in_specs=in_specs,
        out_specs=act_out_spec,
        scratch_shapes=[pltpu.VMEM((TM, D), jnp.float32),   # resident activation
                        pltpu.VMEM((TM, D), jnp.float32)],  # per-layer attention ctx slab
        compiler_params=pltpu.CompilerParams(
            dimension_semantics=("parallel", "arbitrary"),
            vmem_limit_bytes=vmem_limit),
    )(x,
      layers["wqkv"], layers["bqkv"], layers["wo"], layers["bo"],
      layers["g1"], layers["be1"],
      layers["w1"], layers["b1"], layers["w2"], layers["b2"],
      layers["g2"], layers["be2"])


# --------------------------------------------------------------------- lm_head kernel

def lm_head_kernel(x_ref, w_ref, b_ref, o_ref):
    o_ref[...] = (jnp.dot(x_ref[...].astype(jnp.bfloat16), w_ref[...],
                          preferred_element_type=jnp.float32) + b_ref[...])


def run_lm_head(x, lm_w_b16, lm_b):
    M, D = x.shape
    Vpad = lm_w_b16.shape[1]
    tm = _row_tile(M)
    return pl.pallas_call(
        lm_head_kernel,
        out_shape=jax.ShapeDtypeStruct((M, Vpad), jnp.float32),
        grid=(M // tm,),
        in_specs=[pl.BlockSpec((tm, D), lambda i: (i, 0)),
                  pl.BlockSpec((D, Vpad), lambda i: (0, 0)),
                  pl.BlockSpec((1, Vpad), lambda i: (0, 0))],
        out_specs=pl.BlockSpec((tm, Vpad), lambda i: (i, 0)),
        compiler_params=pltpu.CompilerParams(dimension_semantics=("parallel",)),
    )(x, lm_w_b16, lm_b)


# ------------------------------------------------------------------- parameter construction

def make_positional_encoding(max_len, hidden_dim):
    position = jnp.arange(max_len, dtype=jnp.float32)[:, None]
    div_term = jnp.exp(jnp.arange(0, hidden_dim, 2, dtype=jnp.float32)
                       * (-math.log(10000.0) / hidden_dim))
    pe = jnp.zeros((max_len, hidden_dim), dtype=jnp.float32)
    pe = pe.at[:, 0::2].set(jnp.sin(position * div_term))
    pe = pe.at[:, 1::2].set(jnp.cos(position * div_term))
    return pe


def init_params(key, num_layers, hidden_dim, num_heads, ff_dim, vocab_size):
    keys = jax.random.split(key, 2 + num_layers)
    scale = 0.02

    embed = scale * jax.random.normal(keys[0], (vocab_size, hidden_dim), jnp.float32)
    embed = embed.at[vocab_size - 1].set(0.0)   # padding_idx row is zero

    def linear(k, d_in, d_out):
        k1, k2 = jax.random.split(k)
        w = scale * jax.random.normal(k1, (d_in, d_out), jnp.float32)   # (in, out) layout
        b = scale * jax.random.normal(k2, (1, d_out), jnp.float32)
        return w, b

    names = ("wq", "bq", "wk", "bk", "wv", "bv", "wo", "bo",
             "g1", "be1", "w1", "b1", "w2", "b2", "g2", "be2")
    per_layer = {n: [] for n in names}
    for i in range(num_layers):
        lk = jax.random.split(keys[2 + i], 6)
        wq, bq = linear(lk[0], hidden_dim, hidden_dim)
        wk, bk = linear(lk[1], hidden_dim, hidden_dim)
        wv, bv = linear(lk[2], hidden_dim, hidden_dim)
        wo, bo = linear(lk[3], hidden_dim, hidden_dim)
        w1, b1 = linear(lk[4], hidden_dim, ff_dim)
        w2, b2 = linear(lk[5], ff_dim, hidden_dim)
        vals = dict(
            wq=wq, bq=bq, wk=wk, bk=bk, wv=wv, bv=bv, wo=wo, bo=bo,
            g1=jnp.ones((1, hidden_dim), jnp.float32),
            be1=jnp.zeros((1, hidden_dim), jnp.float32),
            w1=w1, b1=b1, w2=w2, b2=b2,
            g2=jnp.ones((1, hidden_dim), jnp.float32),
            be2=jnp.zeros((1, hidden_dim), jnp.float32),
        )
        for n in names:
            per_layer[n].append(vals[n])

    layers = {n: jnp.stack(v, axis=0) for n, v in per_layer.items()}   # (L, ...)
    lm_w, lm_b = linear(keys[1], hidden_dim, vocab_size)
    return dict(embed=embed, layers=layers, lm_w=lm_w, lm_b=lm_b,
                pos_enc=make_positional_encoding(1000, hidden_dim))


def pack_params(p):
    """Fuse Q/K/V, stack per-layer weights, cast matmul weights to bf16, pad lm_head."""
    lay = p["layers"]
    packed_layers = dict(
        wqkv=jnp.concatenate([lay["wq"], lay["wk"], lay["wv"]], axis=-1).astype(jnp.bfloat16),
        bqkv=jnp.concatenate([lay["bq"], lay["bk"], lay["bv"]], axis=-1),
        wo=lay["wo"].astype(jnp.bfloat16), bo=lay["bo"],
        g1=lay["g1"], be1=lay["be1"],
        w1=lay["w1"].astype(jnp.bfloat16), b1=lay["b1"],
        w2=lay["w2"].astype(jnp.bfloat16), b2=lay["b2"],
        g2=lay["g2"], be2=lay["be2"],
    )
    V = p["lm_w"].shape[1]
    Vpad = ((V + 127) // 128) * 128                  # lane-dense lm_head output
    lm_w = jnp.pad(p["lm_w"], ((0, 0), (0, Vpad - V))).astype(jnp.bfloat16)
    lm_b = jnp.pad(p["lm_b"], ((0, 0), (0, Vpad - V)))
    return dict(embed=p["embed"], pos_enc=p["pos_enc"],
                layers=packed_layers, lm_w=lm_w, lm_b=lm_b)


# ------------------------------------------------------------------------------ forward

def character_transformer_forward(params, tokens, *, num_heads, hidden_dim, vocab_size,
                                  tile_B=None):
    B, T = tokens.shape
    # glue: embedding gather + scale + positional encoding (dropout = identity in eval)
    x = params["embed"][tokens] * math.sqrt(hidden_dim)        # (B, T, D)
    x = x + params["pos_enc"][None, :T, :]
    x = x.reshape(B * T, hidden_dim)                            # fold batch into M

    if tile_B is None:
        tile_B = _pick_tile_b(B, T, hidden_dim)

    h = run_decoder(x, params["layers"], num_heads, B, T, tile_B)       # (B*T, D)
    logits_padded = run_lm_head(h, params["lm_w"], params["lm_b"])      # (B*T, Vpad)
    return logits_padded[:, :vocab_size].reshape(B, T, vocab_size)


# -------------------------------------------------------------------------------- main

if __name__ == "__main__":
    num_layers = 2
    hidden_dim = 32
    num_heads = 4
    ff_dim = 64
    vocab_size = 16
    B, T = 2, 8

    key = jax.random.PRNGKey(0)
    pkey, tkey = jax.random.split(key)
    raw_params = init_params(pkey, num_layers, hidden_dim, num_heads, ff_dim, vocab_size)
    params = pack_params(raw_params)
    tokens = jax.random.randint(tkey, (B, T), 0, vocab_size, dtype=jnp.int32)

    fwd = jax.jit(functools.partial(character_transformer_forward,
                                    num_heads=num_heads, hidden_dim=hidden_dim,
                                    vocab_size=vocab_size,
                                    tile_B=1))   # 2 batch tiles -> exercises the parallel axis
    logits = fwd(params, tokens)
    jax.block_until_ready(logits)
    assert logits.shape == (B, T, vocab_size)
    assert bool(jnp.all(jnp.isfinite(logits)))
    print("KERNEL_OK")
</pallas_src>

<mosaic_0001>
module attributes {stable_mosaic.version = 11 : i64} {
  func.func @lm_head_kernel(%arg0: i32, %arg1: memref<16x32xf32, #tpu.memory_space<vmem>>, %arg2: memref<32x128xbf16, #tpu.memory_space<vmem>>, %arg3: memref<1x128xf32, #tpu.memory_space<vmem>>, %arg4: memref<16x128xf32, #tpu.memory_space<vmem>>) attributes {dimension_semantics = [#tpu.dimension_semantics<parallel>], iteration_bounds = array<i64: 1>, scalar_prefetch = 0 : i64, scratch_operands = 0 : i64, tpu.core_type = #tpu.core_type<tc>, window_params = [{transform_indices = @transform_0, window_bounds = array<i64: 16, 32>}, {pipeline_mode = #tpu.pipeline_mode<synchronous>, transform_indices = @transform_1, window_bounds = array<i64: 32, 128>}, {pipeline_mode = #tpu.pipeline_mode<synchronous>, transform_indices = @transform_2, window_bounds = array<i64: 1, 128>}, {transform_indices = @transform_3, window_bounds = array<i64: 16, 128>}]} {
    %c0 = arith.constant 0 : index
    %c0_0 = arith.constant 0 : index
    %0 = vector.load %arg1[%c0, %c0_0] : memref<16x32xf32, #tpu.memory_space<vmem>>, vector<16x32xf32>
    %1 = arith.truncf %0 : vector<16x32xf32> to vector<16x32xbf16>
    %c0_1 = arith.constant 0 : index
    %c0_2 = arith.constant 0 : index
    %2 = vector.load %arg2[%c0_1, %c0_2] : memref<32x128xbf16, #tpu.memory_space<vmem>>, vector<32x128xbf16>
    %cst = arith.constant dense<0.000000e+00> : vector<16x128xf32>
    %3 = tpu.matmul %1, %2, %cst {dimension_numbers = #tpu.dot_dimension_numbers<[1], [0], [0], [1], [0, 0, 1, 1], [], []>} : vector<16x32xbf16>, vector<32x128xbf16>, vector<16x128xf32> -> vector<16x128xf32>
    %c0_3 = arith.constant 0 : index
    %c0_4 = arith.constant 0 : index
    %4 = vector.load %arg3[%c0_3, %c0_4] : memref<1x128xf32, #tpu.memory_space<vmem>>, vector<1x128xf32>
    %5 = vector.broadcast %4 : vector<1x128xf32> to vector<16x128xf32>
    %6 = arith.addf %3, %5 : vector<16x128xf32>
    %c0_5 = arith.constant 0 : index
    %c0_6 = arith.constant 0 : index
    %7 = vector.load %arg4[%c0_5, %c0_6] : memref<16x128xf32, #tpu.memory_space<vmem>>, vector<16x128xf32>
    tpu.vector_store %arg4[%c0_5, %c0_6], %6 {strides = array<i32>} : memref<16x128xf32, #tpu.memory_space<vmem>>, vector<16x128xf32>,
    return
  }
  func.func @transform_0(%arg0: i32) -> (i32, i32) {
    %c0_i32 = arith.constant 0 : i32
    %c0_i32_0 = arith.constant 0 : i32
    return %arg0, %c0_i32 : i32, i32
  }
  func.func @transform_1(%arg0: i32) -> (i32, i32) {
    %c0_i32 = arith.constant 0 : i32
    %c0_i32_0 = arith.constant 0 : i32
    %c0_i32_1 = arith.constant 0 : i32
    return %c0_i32, %c0_i32_0 : i32, i32
  }
  func.func @transform_2(%arg0: i32) -> (i32, i32) {
    %c0_i32 = arith.constant 0 : i32
    %c0_i32_0 = arith.constant 0 : i32
    %c0_i32_1 = arith.constant 0 : i32
    return %c0_i32, %c0_i32_0 : i32, i32
  }
  func.func @transform_3(%arg0: i32) -> (i32, i32) {
    %c0_i32 = arith.constant 0 : i32
    %c0_i32_0 = arith.constant 0 : i32
    return %arg0, %c0_i32 : i32, i32
  }
}

module attributes {stable_mosaic.version = 11 : i64} {
  func.func @decoder_layer_kernel(%arg0: i32, %arg1: i32, %arg2: memref<8x32xf32, #tpu.memory_space<vmem>>, %arg3: memref<1x32x96xbf16, #tpu.memory_space<vmem>>, %arg4: memref<1x1x96xf32, #tpu.memory_space<vmem>>, %arg5: memref<1x32x32xbf16, #tpu.memory_space<vmem>>, %arg6: memref<1x1x32xf32, #tpu.memory_space<vmem>>, %arg7: memref<1x1x32xf32, #tpu.memory_space<vmem>>, %arg8: memref<1x1x32xf32, #tpu.memory_space<vmem>>, %arg9: memref<1x32x64xbf16, #tpu.memory_space<vmem>>, %arg10: memref<1x1x64xf32, #tpu.memory_space<vmem>>, %arg11: memref<1x64x32xbf16, #tpu.memory_space<vmem>>, %arg12: memref<1x1x32xf32, #tpu.memory_space<vmem>>, %arg13: memref<1x1x32xf32, #tpu.memory_space<vmem>>, %arg14: memref<1x1x32xf32, #tpu.memory_space<vmem>>, %arg15: memref<8x32xf32, #tpu.memory_space<vmem>>, %arg16: memref<8x32xf32, #tpu.memory_space<vmem>>, %arg17: memref<8x32xf32, #tpu.memory_space<vmem>>) attributes {dimension_semantics = [#tpu.dimension_semantics<parallel>, #tpu.dimension_semantics<arbitrary>], iteration_bounds = array<i64: 2, 2>, scalar_prefetch = 0 : i64, scratch_operands = 2 : i64, tpu.core_type = #tpu.core_type<tc>, window_params = [{transform_indices = @transform_0, window_bounds = array<i64: 8, 32>}, {transform_indices = @transform_1, window_bounds = array<i64: 1, 32, 96>}, {transform_indices = @transform_2, window_bounds = array<i64: 1, 1, 96>}, {transform_indices = @transform_3, window_bounds = array<i64: 1, 32, 32>}, {transform_indices = @transform_4, window_bounds = array<i64: 1, 1, 32>}, {transform_indices = @transform_5, window_bounds = array<i64: 1, 1, 32>}, {transform_indices = @transform_6, window_bounds = array<i64: 1, 1, 32>}, {transform_indices = @transform_7, window_bounds = array<i64: 1, 32, 64>}, {transform_indices = @transform_8, window_bounds = array<i64: 1, 1, 64>}, {transform_indices = @transform_9, window_bounds = array<i64: 1, 64, 32>}, {transform_indices = @transform_10, window_bounds = array<i64: 1, 1, 32>}, {transform_indices = @transform_11, window_bounds = array<i64: 1, 1, 32>}, {transform_indices = @transform_12, window_bounds = array<i64: 1, 1, 32>}, {transform_indices = @transform_13, window_bounds = array<i64: 8, 32>}]} {
    %c0_i32 = arith.constant 0 : i32
    %0 = arith.cmpi eq, %arg1, %c0_i32 : i32
    %1 = arith.extui %0 : i1 to i32
    %c0_i32_0 = arith.constant 0 : i32
    %2 = arith.cmpi ne, %1, %c0_i32_0 : i32
    scf.if %2 {
      %c0_88 = arith.constant 0 : index
      %c0_89 = arith.constant 0 : index
      %226 = vector.load %arg2[%c0_88, %c0_89] : memref<8x32xf32, #tpu.memory_space<vmem>>, vector<8x32xf32>
      %c0_90 = arith.constant 0 : index
      %c0_91 = arith.constant 0 : index
      %227 = vector.load %arg16[%c0_90, %c0_91] : memref<8x32xf32, #tpu.memory_space<vmem>>, vector<8x32xf32>
      tpu.vector_store %arg16[%c0_90, %c0_91], %226 {strides = array<i32>} : memref<8x32xf32, #tpu.memory_space<vmem>>, vector<8x32xf32>,
    } else {
    }
    %c0 = arith.constant 0 : index
    %c0_1 = arith.constant 0 : index
    %3 = vector.load %arg16[%c0, %c0_1] : memref<8x32xf32, #tpu.memory_space<vmem>>, vector<8x32xf32>
    %4 = arith.truncf %3 : vector<8x32xf32> to vector<8x32xbf16>
    %c0_2 = arith.constant 0 : index
    %c0_3 = arith.constant 0 : index
    %c0_4 = arith.constant 0 : index
    %5 = vector.load %arg3[%c0_2, %c0_3, %c0_4] : memref<1x32x96xbf16, #tpu.memory_space<vmem>>, vector<1x32x96xbf16>
    %6 = vector.shape_cast %5 : vector<1x32x96xbf16> to vector<32x96xbf16>
    %cst = arith.constant dense<0.000000e+00> : vector<8x96xf32>
    %7 = tpu.matmul %4, %6, %cst {dimension_numbers = #tpu.dot_dimension_numbers<[1], [0], [0], [1], [0, 0, 1, 1], [], []>} : vector<8x32xbf16>, vector<32x96xbf16>, vector<8x96xf32> -> vector<8x96xf32>
    %c0_5 = arith.constant 0 : index
    %c0_6 = arith.constant 0 : index
    %c0_7 = arith.constant 0 : index
    %8 = vector.load %arg4[%c0_5, %c0_6, %c0_7] : memref<1x1x96xf32, #tpu.memory_space<vmem>>, vector<1x1x96xf32>
    %9 = vector.shape_cast %8 : vector<1x1x96xf32> to vector<1x96xf32>
    %10 = vector.broadcast %9 : vector<1x96xf32> to vector<8x96xf32>
    %11 = arith.addf %7, %10 : vector<8x96xf32>
    %12 = vector.extract_strided_slice %11 {offsets = [0, 0], sizes = [8, 32], strides = [1, 1]} : vector<8x96xf32> to vector<8x32xf32>
    %13 = vector.extract_strided_slice %11 {offsets = [0, 32], sizes = [8, 32], strides = [1, 1]} : vector<8x96xf32> to vector<8x32xf32>
    %14 = vector.extract_strided_slice %11 {offsets = [0, 64], sizes = [8, 32], strides = [1, 1]} : vector<8x96xf32> to vector<8x32xf32>
    %15 = tpu.iota {dimensions = array<i32: 0>} : vector<8x8xi32>
    %16 = tpu.iota {dimensions = array<i32: 1>} : vector<8x8xi32>
    %17 = arith.cmpi sge, %15, %16 : vector<8x8xi32>
    %18 = vector.extract_strided_slice %12 {offsets = [0, 0], sizes = [8, 8], strides = [1, 1]} : vector<8x32xf32> to vector<8x8xf32>
    %19 = vector.shape_cast %18 : vector<8x8xf32> to vector<1x8x8xf32>
    %20 = arith.truncf %19 : vector<1x8x8xf32> to vector<1x8x8xbf16>
    %21 = vector.extract_strided_slice %13 {offsets = [0, 0], sizes = [8, 8], strides = [1, 1]} : vector<8x32xf32> to vector<8x8xf32>
    %22 = vector.shape_cast %21 : vector<8x8xf32> to vector<1x8x8xf32>
    %23 = arith.truncf %22 : vector<1x8x8xf32> to vector<1x8x8xbf16>
    %24 = vector.extract_strided_slice %14 {offsets = [0, 0], sizes = [8, 8], strides = [1, 1]} : vector<8x32xf32> to vector<8x8xf32>
    %25 = vector.shape_cast %24 : vector<8x8xf32> to vector<1x8x8xf32>
    %26 = arith.truncf %25 : vector<1x8x8xf32> to vector<1x8x8xbf16>
    "tpu.trace_start"() <{level = 10 : i32, message = "bqd,bkd->bqk"}> : () -> ()
    %cst_8 = arith.constant dense<0.000000e+00> : vector<1x8x8xf32>
    %27 = tpu.matmul %20, %23, %cst_8 {dimension_numbers = #tpu.dot_dimension_numbers<[2], [2], [1], [1], [0, 0, 0, 1, 1, 1], [0], [0]>} : vector<1x8x8xbf16>, vector<1x8x8xbf16>, vector<1x8x8xf32> -> vector<1x8x8xf32>
    "tpu.trace_stop"() : () -> ()
    %cst_9 = arith.constant 0.353553385 : f32
    %28 = vector.broadcast %cst_9 : f32 to vector<1x8x8xf32>
    %29 = arith.mulf %27, %28 : vector<1x8x8xf32>
    %30 = vector.shape_cast %17 : vector<8x8xi1> to vector<1x8x8xi1>
    %cst_10 = arith.constant -1.000000e+09 : f32
    %31 = vector.broadcast %cst_10 : f32 to vector<1x8x8xf32>
    %32 = arith.select %30, %29, %31 : vector<1x8x8xi1>, vector<1x8x8xf32>
    %cst_11 = arith.constant dense<0xFF800000> : vector<1x8xf32>
    %33 = vector.multi_reduction <maximumf>, %32, %cst_11 [2] : vector<1x8x8xf32> to vector<1x8xf32>
    %34 = vector.shape_cast %33 : vector<1x8xf32> to vector<1x8x1xf32>
    %35 = vector.broadcast %34 : vector<1x8x1xf32> to vector<1x8x8xf32>
    %36 = arith.subf %32, %35 : vector<1x8x8xf32>
    %37 = math.exp %36 : vector<1x8x8xf32>
    %cst_12 = arith.constant dense<0.000000e+00> : vector<1x8xf32>
    %38 = vector.multi_reduction <add>, %37, %cst_12 [2] : vector<1x8x8xf32> to vector<1x8xf32>
    %39 = vector.shape_cast %38 : vector<1x8xf32> to vector<1x8x1xf32>
    %40 = tpu.reciprocal %39 : vector<1x8x1xf32> -> vector<1x8x1xf32>
    %41 = vector.broadcast %40 : vector<1x8x1xf32> to vector<1x8x8xf32>
    %42 = arith.mulf %37, %41 : vector<1x8x8xf32>
    %43 = arith.truncf %42 : vector<1x8x8xf32> to vector<1x8x8xbf16>
    "tpu.trace_start"() <{level = 10 : i32, message = "bqk,bkd->bqd"}> : () -> ()
    %cst_13 = arith.constant dense<0.000000e+00> : vector<1x8x8xf32>
    %44 = tpu.matmul %43, %26, %cst_13 {dimension_numbers = #tpu.dot_dimension_numbers<[2], [1], [1], [2], [0, 0, 0, 1, 1, 2], [0], [0]>} : vector<1x8x8xbf16>, vector<1x8x8xbf16>, vector<1x8x8xf32> -> vector<1x8x8xf32>
    "tpu.trace_stop"() : () -> ()
    %45 = vector.shape_cast %44 : vector<1x8x8xf32> to vector<8x8xf32>
    %c0_14 = arith.constant 0 : index
    %c0_15 = arith.constant 0 : index
    %46 = vector.load %arg17[%c0_14, %c0_15] : memref<8x32xf32, #tpu.memory_space<vmem>>, vector<8x8xf32>
    tpu.vector_store %arg17[%c0_14, %c0_15], %45 {strides = array<i32>} : memref<8x32xf32, #tpu.memory_space<vmem>>, vector<8x8xf32>,
    %47 = vector.extract_strided_slice %12 {offsets = [0, 8], sizes = [8, 8], strides = [1, 1]} : vector<8x32xf32> to vector<8x8xf32>
    %48 = vector.shape_cast %47 : vector<8x8xf32> to vector<1x8x8xf32>
    %49 = arith.truncf %48 : vector<1x8x8xf32> to vector<1x8x8xbf16>
    %50 = vector.extract_strided_slice %13 {offsets = [0, 8], sizes = [8, 8], strides = [1, 1]} : vector<8x32xf32> to vector<8x8xf32>
    %51 = vector.shape_cast %50 : vector<8x8xf32> to vector<1x8x8xf32>
    %52 = arith.truncf %51 : vector<1x8x8xf32> to vector<1x8x8xbf16>
    %53 = vector.extract_strided_slice %14 {offsets = [0, 8], sizes = [8, 8], strides = [1, 1]} : vector<8x32xf32> to vector<8x8xf32>
    %54 = vector.shape_cast %53 : vector<8x8xf32> to vector<1x8x8xf32>
    %55 = arith.truncf %54 : vector<1x8x8xf32> to vector<1x8x8xbf16>
    "tpu.trace_start"() <{level = 10 : i32, message = "bqd,bkd->bqk"}> : () -> ()
    %cst_16 = arith.constant dense<0.000000e+00> : vector<1x8x8xf32>
    %56 = tpu.matmul %49, %52, %cst_16 {dimension_numbers = #tpu.dot_dimension_numbers<[2], [2], [1], [1], [0, 0, 0, 1, 1, 1], [0], [0]>} : vector<1x8x8xbf16>, vector<1x8x8xbf16>, vector<1x8x8xf32> -> vector<1x8x8xf32>
    "tpu.trace_stop"() : () -> ()
    %cst_17 = arith.constant 0.353553385 : f32
    %57 = vector.broadcast %cst_17 : f32 to vector<1x8x8xf32>
    %58 = arith.mulf %56, %57 : vector<1x8x8xf32>
    %59 = vector.shape_cast %17 : vector<8x8xi1> to vector<1x8x8xi1>
    %cst_18 = arith.constant -1.000000e+09 : f32
    %60 = vector.broadcast %cst_18 : f32 to vector<1x8x8xf32>
    %61 = arith.select %59, %58, %60 : vector<1x8x8xi1>, vector<1x8x8xf32>
    %cst_19 = arith.constant dense<0xFF800000> : vector<1x8xf32>
    %62 = vector.multi_reduction <maximumf>, %61, %cst_19 [2] : vector<1x8x8xf32> to vector<1x8xf32>
    %63 = vector.shape_cast %62 : vector<1x8xf32> to vector<1x8x1xf32>
    %64 = vector.broadcast %63 : vector<1x8x1xf32> to vector<1x8x8xf32>
    %65 = arith.subf %61, %64 : vector<1x8x8xf32>
    %66 = math.exp %65 : vector<1x8x8xf32>
    %cst_20 = arith.constant dense<0.000000e+00> : vector<1x8xf32>
    %67 = vector.multi_reduction <add>, %66, %cst_20 [2] : vector<1x8x8xf32> to vector<1x8xf32>
    %68 = vector.shape_cast %67 : vector<1x8xf32> to vector<1x8x1xf32>
    %69 = tpu.reciprocal %68 : vector<1x8x1xf32> -> vector<1x8x1xf32>
    %70 = vector.broadcast %69 : vector<1x8x1xf32> to vector<1x8x8xf32>
    %71 = arith.mulf %66, %70 : vector<1x8x8xf32>
    %72 = arith.truncf %71 : vector<1x8x8xf32> to vector<1x8x8xbf16>
    "tpu.trace_start"() <{level = 10 : i32, message = "bqk,bkd->bqd"}> : () -> ()
    %cst_21 = arith.constant dense<0.000000e+00> : vector<1x8x8xf32>
    %73 = tpu.matmul %72, %55, %cst_21 {dimension_numbers = #tpu.dot_dimension_numbers<[2], [1], [1], [2], [0, 0, 0, 1, 1, 2], [0], [0]>} : vector<1x8x8xbf16>, vector<1x8x8xbf16>, vector<1x8x8xf32> -> vector<1x8x8xf32>
    "tpu.trace_stop"() : () -> ()
    %74 = vector.shape_cast %73 : vector<1x8x8xf32> to vector<8x8xf32>
    %c0_22 = arith.constant 0 : index
    %c8 = arith.constant 8 : index
    %75 = vector.load %arg17[%c0_22, %c8] : memref<8x32xf32, #tpu.memory_space<vmem>>, vector<8x8xf32>
    tpu.vector_store %arg17[%c0_22, %c8], %74 {strides = array<i32>} : memref<8x32xf32, #tpu.memory_space<vmem>>, vector<8x8xf32>,
    %76 = vector.extract_strided_slice %12 {offsets = [0, 16], sizes = [8, 8], strides = [1, 1]} : vector<8x32xf32> to vector<8x8xf32>
    %77 = vector.shape_cast %76 : vector<8x8xf32> to vector<1x8x8xf32>
    %78 = arith.truncf %77 : vector<1x8x8xf32> to vector<1x8x8xbf16>
    %79 = vector.extract_strided_slice %13 {offsets = [0, 16], sizes = [8, 8], strides = [1, 1]} : vector<8x32xf32> to vector<8x8xf32>
    %80 = vector.shape_cast %79 : vector<8x8xf32> to vector<1x8x8xf32>
    %81 = arith.truncf %80 : vector<1x8x8xf32> to vector<1x8x8xbf16>
    %82 = vector.extract_strided_slice %14 {offsets = [0, 16], sizes = [8, 8], strides = [1, 1]} : vector<8x32xf32> to vector<8x8xf32>
    %83 = vector.shape_cast %82 : vector<8x8xf32> to vector<1x8x8xf32>
    %84 = arith.truncf %83 : vector<1x8x8xf32> to vector<1x8x8xbf16>
    "tpu.trace_start"() <{level = 10 : i32, message = "bqd,bkd->bqk"}> : () -> ()
    %cst_23 = arith.constant dense<0.000000e+00> : vector<1x8x8xf32>
    %85 = tpu.matmul %78, %81, %cst_23 {dimension_numbers = #tpu.dot_dimension_numbers<[2], [2], [1], [1], [0, 0, 0, 1, 1, 1], [0], [0]>} : vector<1x8x8xbf16>, vector<1x8x8xbf16>, vector<1x8x8xf32> -> vector<1x8x8xf32>
    "tpu.trace_stop"() : () -> ()
    %cst_24 = arith.constant 0.353553385 : f32
    %86 = vector.broadcast %cst_24 : f32 to vector<1x8x8xf32>
    %87 = arith.mulf %85, %86 : vector<1x8x8xf32>
    %88 = vector.shape_cast %17 : vector<8x8xi1> to vector<1x8x8xi1>
    %cst_25 = arith.constant -1.000000e+09 : f32
    %89 = vector.broadcast %cst_25 : f32 to vector<1x8x8xf32>
    %90 = arith.select %88, %87, %89 : vector<1x8x8xi1>, vector<1x8x8xf32>
    %cst_26 = arith.constant dense<0xFF800000> : vector<1x8xf32>
    %91 = vector.multi_reduction <maximumf>, %90, %cst_26 [2] : vector<1x8x8xf32> to vector<1x8xf32>
    %92 = vector.shape_cast %91 : vector<1x8xf32> to vector<1x8x1xf32>
    %93 = vector.broadcast %92 : vector<1x8x1xf32> to vector<1x8x8xf32>
    %94 = arith.subf %90, %93 : vector<1x8x8xf32>
    %95 = math.exp %94 : vector<1x8x8xf32>
    %cst_27 = arith.constant dense<0.000000e+00> : vector<1x8xf32>
    %96 = vector.multi_reduction <add>, %95, %cst_27 [2] : vector<1x8x8xf32> to vector<1x8xf32>
    %97 = vector.shape_cast %96 : vector<1x8xf32> to vector<1x8x1xf32>
    %98 = tpu.reciprocal %97 : vector<1x8x1xf32> -> vector<1x8x1xf32>
    %99 = vector.broadcast %98 : vector<1x8x1xf32> to vector<1x8x8xf32>
    %100 = arith.mulf %95, %99 : vector<1x8x8xf32>
    %101 = arith.truncf %100 : vector<1x8x8xf32> to vector<1x8x8xbf16>
    "tpu.trace_start"() <{level = 10 : i32, message = "bqk,bkd->bqd"}> : () -> ()
    %cst_28 = arith.constant dense<0.000000e+00> : vector<1x8x8xf32>
    %102 = tpu.matmul %101, %84, %cst_28 {dimension_numbers = #tpu.dot_dimension_numbers<[2], [1], [1], [2], [0, 0, 0, 1, 1, 2], [0], [0]>} : vector<1x8x8xbf16>, vector<1x8x8xbf16>, vector<1x8x8xf32> -> vector<1x8x8xf32>
    "tpu.trace_stop"() : () -> ()
    %103 = vector.shape_cast %102 : vector<1x8x8xf32> to vector<8x8xf32>
    %c0_29 = arith.constant 0 : index
    %c16 = arith.constant 16 : index
    %104 = vector.load %arg17[%c0_29, %c16] : memref<8x32xf32, #tpu.memory_space<vmem>>, vector<8x8xf32>
    tpu.vector_store %arg17[%c0_29, %c16], %103 {strides = array<i32>} : memref<8x32xf32, #tpu.memory_space<vmem>>, vector<8x8xf32>,
    %105 = vector.extract_strided_slice %12 {offsets = [0, 24], sizes = [8, 8], strides = [1, 1]} : vector<8x32xf32> to vector<8x8xf32>
    %106 = vector.shape_cast %105 : vector<8x8xf32> to vector<1x8x8xf32>
    %107 = arith.truncf %106 : vector<1x8x8xf32> to vector<1x8x8xbf16>
    %108 = vector.extract_strided_slice %13 {offsets = [0, 24], sizes = [8, 8], strides = [1, 1]} : vector<8x32xf32> to vector<8x8xf32>
    %109 = vector.shape_cast %108 : vector<8x8xf32> to vector<1x8x8xf32>
    %110 = arith.truncf %109 : vector<1x8x8xf32> to vector<1x8x8xbf16>
    %111 = vector.extract_strided_slice %14 {offsets = [0, 24], sizes = [8, 8], strides = [1, 1]} : vector<8x32xf32> to vector<8x8xf32>
    %112 = vector.shape_cast %111 : vector<8x8xf32> to vector<1x8x8xf32>
    %113 = arith.truncf %112 : vector<1x8x8xf32> to vector<1x8x8xbf16>
    "tpu.trace_start"() <{level = 10 : i32, message = "bqd,bkd->bqk"}> : () -> ()
    %cst_30 = arith.constant dense<0.000000e+00> : vector<1x8x8xf32>
    %114 = tpu.matmul %107, %110, %cst_30 {dimension_numbers = #tpu.dot_dimension_numbers<[2], [2], [1], [1], [0, 0, 0, 1, 1, 1], [0], [0]>} : vector<1x8x8xbf16>, vector<1x8x8xbf16>, vector<1x8x8xf32> -> vector<1x8x8xf32>
    "tpu.trace_stop"() : () -> ()
    %cst_31 = arith.constant 0.353553385 : f32
    %115 = vector.broadcast %cst_31 : f32 to vector<1x8x8xf32>
    %116 = arith.mulf %114, %115 : vector<1x8x8xf32>
    %117 = vector.shape_cast %17 : vector<8x8xi1> to vector<1x8x8xi1>
    %cst_32 = arith.constant -1.000000e+09 : f32
    %118 = vector.broadcast %cst_32 : f32 to vector<1x8x8xf32>
    %119 = arith.select %117, %116, %118 : vector<1x8x8xi1>, vector<1x8x8xf32>
    %cst_33 = arith.constant dense<0xFF800000> : vector<1x8xf32>
    %120 = vector.multi_reduction <maximumf>, %119, %cst_33 [2] : vector<1x8x8xf32> to vector<1x8xf32>
    %121 = vector.shape_cast %120 : vector<1x8xf32> to vector<1x8x1xf32>
    %122 = vector.broadcast %121 : vector<1x8x1xf32> to vector<1x8x8xf32>
    %123 = arith.subf %119, %122 : vector<1x8x8xf32>
    %124 = math.exp %123 : vector<1x8x8xf32>
    %cst_34 = arith.constant dense<0.000000e+00> : vector<1x8xf32>
    %125 = vector.multi_reduction <add>, %124, %cst_34 [2] : vector<1x8x8xf32> to vector<1x8xf32>
    %126 = vector.shape_cast %125 : vector<1x8xf32> to vector<1x8x1xf32>
    %127 = tpu.reciprocal %126 : vector<1x8x1xf32> -> vector<1x8x1xf32>
    %128 = vector.broadcast %127 : vector<1x8x1xf32> to vector<1x8x8xf32>
    %129 = arith.mulf %124, %128 : vector<1x8x8xf32>
    %130 = arith.truncf %129 : vector<1x8x8xf32> to vector<1x8x8xbf16>
    "tpu.trace_start"() <{level = 10 : i32, message = "bqk,bkd->bqd"}> : () -> ()
    %cst_35 = arith.constant dense<0.000000e+00> : vector<1x8x8xf32>
    %131 = tpu.matmul %130, %113, %cst_35 {dimension_numbers = #tpu.dot_dimension_numbers<[2], [1], [1], [2], [0, 0, 0, 1, 1, 2], [0], [0]>} : vector<1x8x8xbf16>, vector<1x8x8xbf16>, vector<1x8x8xf32> -> vector<1x8x8xf32>
    "tpu.trace_stop"() : () -> ()
    %132 = vector.shape_cast %131 : vector<1x8x8xf32> to vector<8x8xf32>
    %c0_36 = arith.constant 0 : index
    %c24 = arith.constant 24 : index
    %133 = vector.load %arg17[%c0_36, %c24] : memref<8x32xf32, #tpu.memory_space<vmem>>, vector<8x8xf32>
    tpu.vector_store %arg17[%c0_36, %c24], %132 {strides = array<i32>} : memref<8x32xf32, #tpu.memory_space<vmem>>, vector<8x8xf32>,
    %c0_37 = arith.constant 0 : index
    %c0_38 = arith.constant 0 : index
    %134 = vector.load %arg17[%c0_37, %c0_38] : memref<8x32xf32, #tpu.memory_space<vmem>>, vector<8x32xf32>
    %135 = arith.truncf %134 : vector<8x32xf32> to vector<8x32xbf16>
    %c0_39 = arith.constant 0 : index
    %c0_40 = arith.constant 0 : index
    %c0_41 = arith.constant 0 : index
    %136 = vector.load %arg5[%c0_39, %c0_40, %c0_41] : memref<1x32x32xbf16, #tpu.memory_space<vmem>>, vector<1x32x32xbf16>
    %137 = vector.shape_cast %136 : vector<1x32x32xbf16> to vector<32x32xbf16>
    %cst_42 = arith.constant dense<0.000000e+00> : vector<8x32xf32>
    %138 = tpu.matmul %135, %137, %cst_42 {dimension_numbers = #tpu.dot_dimension_numbers<[1], [0], [0], [1], [0, 0, 1, 1], [], []>} : vector<8x32xbf16>, vector<32x32xbf16>, vector<8x32xf32> -> vector<8x32xf32>
    %c0_43 = arith.constant 0 : index
    %c0_44 = arith.constant 0 : index
    %c0_45 = arith.constant 0 : index
    %139 = vector.load %arg6[%c0_43, %c0_44, %c0_45] : memref<1x1x32xf32, #tpu.memory_space<vmem>>, vector<1x1x32xf32>
    %140 = vector.shape_cast %139 : vector<1x1x32xf32> to vector<1x32xf32>
    %141 = vector.broadcast %140 : vector<1x32xf32> to vector<8x32xf32>
    %142 = arith.addf %138, %141 : vector<8x32xf32>
    %143 = arith.addf %142, %3 : vector<8x32xf32>
    %c0_46 = arith.constant 0 : index
    %c0_47 = arith.constant 0 : index
    %c0_48 = arith.constant 0 : index
    %144 = vector.load %arg7[%c0_46, %c0_47, %c0_48] : memref<1x1x32xf32, #tpu.memory_space<vmem>>, vector<1x1x32xf32>
    %145 = vector.shape_cast %144 : vector<1x1x32xf32> to vector<1x32xf32>
    %c0_49 = arith.constant 0 : index
    %c0_50 = arith.constant 0 : index
    %c0_51 = arith.constant 0 : index
    %146 = vector.load %arg8[%c0_49, %c0_50, %c0_51] : memref<1x1x32xf32, #tpu.memory_space<vmem>>, vector<1x1x32xf32>
    %147 = vector.shape_cast %146 : vector<1x1x32xf32> to vector<1x32xf32>
    %cst_52 = arith.constant dense<0.000000e+00> : vector<8xf32>
    %148 = vector.multi_reduction <add>, %143, %cst_52 [1] : vector<8x32xf32> to vector<8xf32>
    %149 = vector.shape_cast %148 : vector<8xf32> to vector<8x1xf32>
    %cst_53 = arith.constant 3.200000e+01 : f32
    %150 = vector.broadcast %cst_53 : f32 to vector<8x1xf32>
    %151 = arith.divf %149, %150 : vector<8x1xf32>
    %152 = vector.broadcast %151 : vector<8x1xf32> to vector<8x32xf32>
    %153 = arith.subf %143, %152 : vector<8x32xf32>
    %154 = arith.mulf %153, %153 : vector<8x32xf32>
    %cst_54 = arith.constant dense<0.000000e+00> : vector<8xf32>
    %155 = vector.multi_reduction <add>, %154, %cst_54 [1] : vector<8x32xf32> to vector<8xf32>
    %156 = vector.shape_cast %155 : vector<8xf32> to vector<8x1xf32>
    %cst_55 = arith.constant 3.200000e+01 : f32
    %157 = vector.broadcast %cst_55 : f32 to vector<8x1xf32>
    %158 = arith.divf %156, %157 : vector<8x1xf32>
    %159 = vector.broadcast %151 : vector<8x1xf32> to vector<8x32xf32>
    %160 = arith.subf %143, %159 : vector<8x32xf32>
    %cst_56 = arith.constant 9.99999974E-6 : f32
    %161 = vector.broadcast %cst_56 : f32 to vector<8x1xf32>
    %162 = arith.addf %158, %161 : vector<8x1xf32>
    %163 = math.rsqrt %162 : vector<8x1xf32>
    %164 = vector.broadcast %163 : vector<8x1xf32> to vector<8x32xf32>
    %165 = arith.mulf %160, %164 : vector<8x32xf32>
    %166 = vector.broadcast %145 : vector<1x32xf32> to vector<8x32xf32>
    %167 = arith.mulf %165, %166 : vector<8x32xf32>
    %168 = vector.broadcast %147 : vector<1x32xf32> to vector<8x32xf32>
    %169 = arith.addf %167, %168 : vector<8x32xf32>
    %170 = arith.truncf %169 : vector<8x32xf32> to vector<8x32xbf16>
    %c0_57 = arith.constant 0 : index
    %c0_58 = arith.constant 0 : index
    %c0_59 = arith.constant 0 : index
    %171 = vector.load %arg9[%c0_57, %c0_58, %c0_59] : memref<1x32x64xbf16, #tpu.memory_space<vmem>>, vector<1x32x64xbf16>
    %172 = vector.shape_cast %171 : vector<1x32x64xbf16> to vector<32x64xbf16>
    %cst_60 = arith.constant dense<0.000000e+00> : vector<8x64xf32>
    %173 = tpu.matmul %170, %172, %cst_60 {dimension_numbers = #tpu.dot_dimension_numbers<[1], [0], [0], [1], [0, 0, 1, 1], [], []>} : vector<8x32xbf16>, vector<32x64xbf16>, vector<8x64xf32> -> vector<8x64xf32>
    %c0_61 = arith.constant 0 : index
    %c0_62 = arith.constant 0 : index
    %c0_63 = arith.constant 0 : index
    %174 = vector.load %arg10[%c0_61, %c0_62, %c0_63] : memref<1x1x64xf32, #tpu.memory_space<vmem>>, vector<1x1x64xf32>
    %175 = vector.shape_cast %174 : vector<1x1x64xf32> to vector<1x64xf32>
    %176 = vector.broadcast %175 : vector<1x64xf32> to vector<8x64xf32>
    %177 = arith.addf %173, %176 : vector<8x64xf32>
    %cst_64 = arith.constant 5.000000e-01 : f32
    %178 = vector.broadcast %cst_64 : f32 to vector<8x64xf32>
    %179 = arith.mulf %178, %177 : vector<8x64xf32>
    %cst_65 = arith.constant 2.000000e+00 : f32
    %180 = math.sqrt %cst_65 : f32
    %181 = vector.broadcast %180 : f32 to vector<8x64xf32>
    %182 = arith.divf %177, %181 : vector<8x64xf32>
    %183 = math.erf %182 : vector<8x64xf32>
    %cst_66 = arith.constant 1.000000e+00 : f32
    %184 = vector.broadcast %cst_66 : f32 to vector<8x64xf32>
    %185 = arith.addf %184, %183 : vector<8x64xf32>
    %186 = arith.mulf %179, %185 : vector<8x64xf32>
    %187 = arith.truncf %186 : vector<8x64xf32> to vector<8x64xbf16>
    %c0_67 = arith.constant 0 : index
    %c0_68 = arith.constant 0 : index
    %c0_69 = arith.constant 0 : index
    %188 = vector.load %arg11[%c0_67, %c0_68, %c0_69] : memref<1x64x32xbf16, #tpu.memory_space<vmem>>, vector<1x64x32xbf16>
    %189 = vector.shape_cast %188 : vector<1x64x32xbf16> to vector<64x32xbf16>
    %cst_70 = arith.constant dense<0.000000e+00> : vector<8x32xf32>
    %190 = tpu.matmul %187, %189, %cst_70 {dimension_numbers = #tpu.dot_dimension_numbers<[1], [0], [0], [1], [0, 0, 1, 1], [], []>} : vector<8x64xbf16>, vector<64x32xbf16>, vector<8x32xf32> -> vector<8x32xf32>
    %c0_71 = arith.constant 0 : index
    %c0_72 = arith.constant 0 : index
    %c0_73 = arith.constant 0 : index
    %191 = vector.load %arg12[%c0_71, %c0_72, %c0_73] : memref<1x1x32xf32, #tpu.memory_space<vmem>>, vector<1x1x32xf32>
    %192 = vector.shape_cast %191 : vector<1x1x32xf32> to vector<1x32xf32>
    %193 = vector.broadcast %192 : vector<1x32xf32> to vector<8x32xf32>
    %194 = arith.addf %190, %193 : vector<8x32xf32>
    %195 = arith.addf %194, %169 : vector<8x32xf32>
    %c0_74 = arith.constant 0 : index
    %c0_75 = arith.constant 0 : index
    %c0_76 = arith.constant 0 : index
    %196 = vector.load %arg13[%c0_74, %c0_75, %c0_76] : memref<1x1x32xf32, #tpu.memory_space<vmem>>, vector<1x1x32xf32>
    %197 = vector.shape_cast %196 : vector<1x1x32xf32> to vector<1x32xf32>
    %c0_77 = arith.constant 0 : index
    %c0_78 = arith.constant 0 : index
    %c0_79 = arith.constant 0 : index
    %198 = vector.load %arg14[%c0_77, %c0_78, %c0_79] : memref<1x1x32xf32, #tpu.memory_space<vmem>>, vector<1x1x32xf32>
    %199 = vector.shape_cast %198 : vector<1x1x32xf32> to vector<1x32xf32>
    %cst_80 = arith.constant dense<0.000000e+00> : vector<8xf32>
    %200 = vector.multi_reduction <add>, %195, %cst_80 [1] : vector<8x32xf32> to vector<8xf32>
    %201 = vector.shape_cast %200 : vector<8xf32> to vector<8x1xf32>
    %cst_81 = arith.constant 3.200000e+01 : f32
    %202 = vector.broadcast %cst_81 : f32 to vector<8x1xf32>
    %203 = arith.divf %201, %202 : vector<8x1xf32>
    %204 = vector.broadcast %203 : vector<8x1xf32> to vector<8x32xf32>
    %205 = arith.subf %195, %204 : vector<8x32xf32>
    %206 = arith.mulf %205, %205 : vector<8x32xf32>
    %cst_82 = arith.constant dense<0.000000e+00> : vector<8xf32>
    %207 = vector.multi_reduction <add>, %206, %cst_82 [1] : vector<8x32xf32> to vector<8xf32>
    %208 = vector.shape_cast %207 : vector<8xf32> to vector<8x1xf32>
    %cst_83 = arith.constant 3.200000e+01 : f32
    %209 = vector.broadcast %cst_83 : f32 to vector<8x1xf32>
    %210 = arith.divf %208, %209 : vector<8x1xf32>
    %211 = vector.broadcast %203 : vector<8x1xf32> to vector<8x32xf32>
    %212 = arith.subf %195, %211 : vector<8x32xf32>
    %cst_84 = arith.constant 9.99999974E-6 : f32
    %213 = vector.broadcast %cst_84 : f32 to vector<8x1xf32>
    %214 = arith.addf %210, %213 : vector<8x1xf32>
    %215 = math.rsqrt %214 : vector<8x1xf32>
    %216 = vector.broadcast %215 : vector<8x1xf32> to vector<8x32xf32>
    %217 = arith.mulf %212, %216 : vector<8x32xf32>
    %218 = vector.broadcast %197 : vector<1x32xf32> to vector<8x32xf32>
    %219 = arith.mulf %217, %218 : vector<8x32xf32>
    %220 = vector.broadcast %199 : vector<1x32xf32> to vector<8x32xf32>
    %221 = arith.addf %219, %220 : vector<8x32xf32>
    %c0_85 = arith.constant 0 : index
    %c0_86 = arith.constant 0 : index
    %222 = vector.load %arg16[%c0_85, %c0_86] : memref<8x32xf32, #tpu.memory_space<vmem>>, vector<8x32xf32>
    tpu.vector_store %arg16[%c0_85, %c0_86], %221 {strides = array<i32>} : memref<8x32xf32, #tpu.memory_space<vmem>>, vector<8x32xf32>,
    %c1_i32 = arith.constant 1 : i32
    %223 = arith.cmpi eq, %arg1, %c1_i32 : i32
    %224 = arith.extui %223 : i1 to i32
    %c0_i32_87 = arith.constant 0 : i32
    %225 = arith.cmpi ne, %224, %c0_i32_87 : i32
    scf.if %225 {
      %c0_88 = arith.constant 0 : index
      %c0_89 = arith.constant 0 : index
      %226 = vector.load %arg15[%c0_88, %c0_89] : memref<8x32xf32, #tpu.memory_space<vmem>>, vector<8x32xf32>
      tpu.vector_store %arg15[%c0_88, %c0_89], %221 {strides = array<i32>} : memref<8x32xf32, #tpu.memory_space<vmem>>, vector<8x32xf32>,
    } else {
    }
    return
  }
  func.func @transform_0(%arg0: i32, %arg1: i32) -> (i32, i32) {
    %c0_i32 = arith.constant 0 : i32
    %c0_i32_0 = arith.constant 0 : i32
    return %arg0, %c0_i32 : i32, i32
  }
  func.func @transform_1(%arg0: i32, %arg1: i32) -> (i32, i32, i32) {
    %c0_i32 = arith.constant 0 : i32
    %c0_i32_0 = arith.constant 0 : i32
    %c0_i32_1 = arith.constant 0 : i32
    return %arg1, %c0_i32, %c0_i32_0 : i32, i32, i32
  }
  func.func @transform_2(%arg0: i32, %arg1: i32) -> (i32, i32, i32) {
    %c0_i32 = arith.constant 0 : i32
    %c0_i32_0 = arith.constant 0 : i32
    %c0_i32_1 = arith.constant 0 : i32
    return %arg1, %c0_i32, %c0_i32_0 : i32, i32, i32
  }
  func.func @transform_3(%arg0: i32, %arg1: i32) -> (i32, i32, i32) {
    %c0_i32 = arith.constant 0 : i32
    %c0_i32_0 = arith.constant 0 : i32
    %c0_i32_1 = arith.constant 0 : i32
    return %arg1, %c0_i32, %c0_i32_0 : i32, i32, i32
  }
  func.func @transform_4(%arg0: i32, %arg1: i32) -> (i32, i32, i32) {
    %c0_i32 = arith.constant 0 : i32
    %c0_i32_0 = arith.constant 0 : i32
    %c0_i32_1 = arith.constant 0 : i32
    return %arg1, %c0_i32, %c0_i32_0 : i32, i32, i32
  }
  func.func @transform_5(%arg0: i32, %arg1: i32) -> (i32, i32, i32) {
    %c0_i32 = arith.constant 0 : i32
    %c0_i32_0 = arith.constant 0 : i32
    %c0_i32_1 = arith.constant 0 : i32
    return %arg1, %c0_i32, %c0_i32_0 : i32, i32, i32
  }
  func.func @transform_6(%arg0: i32, %arg1: i32) -> (i32, i32, i32) {
    %c0_i32 = arith.constant 0 : i32
    %c0_i32_0 = arith.constant 0 : i32
    %c0_i32_1 = arith.constant 0 : i32
    return %arg1, %c0_i32, %c0_i32_0 : i32, i32, i32
  }
  func.func @transform_7(%arg0: i32, %arg1: i32) -> (i32, i32, i32) {
    %c0_i32 = arith.constant 0 : i32
    %c0_i32_0 = arith.constant 0 : i32
    %c0_i32_1 = arith.constant 0 : i32
    return %arg1, %c0_i32, %c0_i32_0 : i32, i32, i32
  }
  func.func @transform_8(%arg0: i32, %arg1: i32) -> (i32, i32, i32) {
    %c0_i32 = arith.constant 0 : i32
    %c0_i32_0 = arith.constant 0 : i32
    %c0_i32_1 = arith.constant 0 : i32
    return %arg1, %c0_i32, %c0_i32_0 : i32, i32, i32
  }
  func.func @transform_9(%arg0: i32, %arg1: i32) -> (i32, i32, i32) {
    %c0_i32 = arith.constant 0 : i32
    %c0_i32_0 = arith.constant 0 : i32
    %c0_i32_1 = arith.constant 0 : i32
    return %arg1, %c0_i32, %c0_i32_0 : i32, i32, i32
  }
  func.func @transform_10(%arg0: i32, %arg1: i32) -> (i32, i32, i32) {
    %c0_i32 = arith.constant 0 : i32
    %c0_i32_0 = arith.constant 0 : i32
    %c0_i32_1 = arith.constant 0 : i32
    return %arg1, %c0_i32, %c0_i32_0 : i32, i32, i32
  }
  func.func @transform_11(%arg0: i32, %arg1: i32) -> (i32, i32, i32) {
    %c0_i32 = arith.constant 0 : i32
    %c0_i32_0 = arith.constant 0 : i32
    %c0_i32_1 = arith.constant 0 : i32
    return %arg1, %c0_i32, %c0_i32_0 : i32, i32, i32
  }
  func.func @transform_12(%arg0: i32, %arg1: i32) -> (i32, i32, i32) {
    %c0_i32 = arith.constant 0 : i32
    %c0_i32_0 = arith.constant 0 : i32
    %c0_i32_1 = arith.constant 0 : i32
    return %arg1, %c0_i32, %c0_i32_0 : i32, i32, i32
  }
  func.func @transform_13(%arg0: i32, %arg1: i32) -> (i32, i32) {
    %c0_i32 = arith.constant 0 : i32
    %c0_i32_0 = arith.constant 0 : i32
    return %arg0, %c0_i32 : i32, i32
  }
}

</mosaic_0001>

<bundles_post_ra>
// kernel: character_transformer_forward.3
= control target key start
LH: loop header
LB: loop body
LE: loop exit
PB: predicated region body
PF: predicated region fallthrough
CT: control target
= control target key end

     0   :  { %v111_v0 = vmov 0.0   ;;  %vm112_vm0 = vmmov 0   ;;  %vm41_vm1 = vcmask 261120   ;;  %s154_s1 = inlined_call_operand.vmem [shape: bf16[32,128], index: 1, kind: input, shape index: {}]   ;;  %s155_s0 = inlined_call_operand.vmem [shape: f32[16,32], index: 0, kind: input, shape index: {}]   ;;  %s156_s2 = inlined_call_operand.vmem [shape: f32[1,128], index: 2, kind: input, shape index: {}]   ;;  %s157_s3 = inlined_call_operand.vmem [shape: f32[16,128], index: 3, kind: output, shape index: {}]  }
   0x1   :  { %99 = vmatprep.subr.bf16.mxu0 %v111_v0  ;;  %v109_v1 = vld [vmem:[%s154_s1] sm:$0xff]   ;;  %103 = vmatprep.mubr.msk.bf16.mxu0 %vm112_vm0, %v111_v0  ;;  %v110_v2 = vld [vmem:[%s154_s1 + $0x8] sm:$0xff]  }
   0x2   :  { %100 = vmatpush3.bf16.msra.mxu0 %v109_v1  ;;  %v15_v3 = vld [vmem:[%s155_s0] sm:$0xff]  ;;  %v16_v4 = vld [vmem:[%s155_s0 + $0x8] sm:$0xff] }
   0x3   :  { %101 = vmatprep.subr.bf16.mxu0 %v111_v0  ;;  %v17_v5 = vpack.c.bf16 %v16_v4, %v15_v3  ;;  %v92_v6 = vld [vmem:[%s156_s2] ss:$0 sm:$0xff] }
   0x6   :  { %102 = vmatpush3.bf16.msra.mxu0 %v110_v2 }
   0x9   :  { %104 = vmatmul.mubr.msk.bf16.vlgmr.msra.gmra.mrb[0].mxu0 %vm41_vm1, %v17_v5 }
  0xdc   :  { %v79_v7 = vpop.f32.mrb[0].mxu0 }
  0xdd   :  { %v80_v8 = vadd.f32 %v92_v6, %v79_v7  ;;  %v105_v9 = vpop.f32.mrb[1].mxu0 }
  0xde   :  { %v82_v10 = vpop.f32.mrb[2].mxu0 }
  0xdf   :  { %86 = vst [vmem:[%s157_s3] sm:$0xff] %v80_v8  ;;  %v83_v11 = vadd.f32 %v92_v6, %v82_v10  ;;  %v106_v12 = vpop.f32.mrb[3].mxu0 }
  0xe1   :  { %87 = vst [vmem:[%s157_s3 + $0x8] sm:$0xff] %v83_v11 }

// kernel: character_transformer_forward.2
= control target key start
LH: loop header
LB: loop body
LE: loop exit
PB: predicated region body
PF: predicated region fallthrough
CT: control target
= control target key end

     0   :  { %s2048_s25 = smov 0   ;;  %s2050_s26 = smov 0   ;;  %s2309_s0 = inlined_call_operand.vmem [shape: f32[16,32], index: 0, kind: input, shape index: {}]   ;;  %s2310_s1 = inlined_call_operand.vmem [shape: bf16[2,32,96], index: 1, kind: input, shape index: {}]   ;;  %s2311_s2 = inlined_call_operand.vmem [shape: f32[2,1,96], index: 2, kind: input, shape index: {}]   ;;  %s2312_s3 = inlined_call_operand.vmem [shape: bf16[2,32,32], index: 3, kind: input, shape index: {}]   ;;  %s2313_s4 = inlined_call_operand.vmem [shape: f32[2,1,32], index: 4, kind: input, shape index: {}]   ;;  %s2314_s5 = inlined_call_operand.vmem [shape: f32[2,1,32], index: 5, kind: input, shape index: {}]   ;;  %s2315_s6 = inlined_call_operand.vmem [shape: f32[2,1,32], index: 6, kind: input, shape index: {}]   ;;  %s2316_s7 = inlined_call_operand.vmem [shape: bf16[2,32,64], index: 7, kind: input, shape index: {}]   ;;  %s2317_s8 = inlined_call_operand.vmem [shape: f32[2,1,64], index: 8, kind: input, shape index: {}]   ;;  %s2318_s9 = inlined_call_operand.vmem [shape: bf16[2,64,32], index: 9, kind: input, shape index: {}]   ;;  %s2319_s10 = inlined_call_operand.vmem [shape: f32[2,1,32], index: 10, kind: input, shape index: {}]   ;;  %s2320_s11 = inlined_call_operand.vmem [shape: f32[2,1,32], index: 11, kind: input, shape index: {}]   ;;  %s2321_s12 = inlined_call_operand.vmem [shape: f32[2,1,32], index: 12, kind: input, shape index: {}]   ;;  %s2322_s13 = inlined_call_operand.vmem [shape: f32[16,32], index: 13, kind: output, shape index: {}]  }
   0x1   :  { %2327 = sst [smem:[#allocation10_spill]] %s2309_s0  ;;  %s2052_s27 = smov 0  }
   0x2   :  { %2328 = sst [smem:[#allocation11_spill]] %s2310_s1  ;;  %s2054_s28 = smov 0  }
   0x3   :  { %2329 = sst [smem:[#allocation12_spill]] %s2312_s3  ;;  %s2056_s29 = smov 0  }
   0x4   :  { %2330 = sst [smem:[#allocation13_spill]] %s2316_s7 }
   0x5   :  { %2331 = sst [smem:[#allocation14_spill]] %s2317_s8 }
   0x6   :  { %2332 = sst [smem:[#allocation15_spill]] %s2321_s12 }
   0x7   :  { %2333 = sst [smem:[#allocation16_spill]] %s2322_s13 }
   0x8 LB: > { %2334 = sst [smem:[#allocation4_spill]] %s1944_s25  ;;  %s32_s30 = sadd.s32 1, %s1952_s27  ;;  %s1960_s29 = sphi %s2056_s29, %s23_s29   ;;  %s1956_s28 = sphi %s2054_s28, %s2360_s28   ;;  %s1952_s27 = sphi %s2052_s27, %s2359_s27   ;;  %s1948_s26 = sphi %s2050_s26, %s2358_s26   ;;  %s1944_s25 = sphi %s2048_s25, %s2357_s25  }
   0x9   : > { %2335 = sst [smem:[#allocation5_spill]] %s1952_s27  ;;  %s35_s14 = sadd.s32 1, %s1956_s28 }
   0xa   : > { %2336 = sst [smem:[#allocation6_spill]] %s1956_s28  ;;  %p33_p0 = scmp.ge.s32.totalorder %s32_s30, 2 }
   0xb   : > { %2337 = sst [smem:[#allocation7_spill]] %s1960_s29  ;;  %p1671_p1 = scmp.ge.s32.totalorder %s1960_s29, 1 }
   0xc   : > { %p502_p2 = scmp.lt.s32.totalorder %s1960_s29, 5  ;;  %s2362_s30 = smov (%p33_p0, %s32_s30), 0 }
   0xd   : > { %2338 = sst [smem:[#allocation8_spill]] %s2362_s30  ;;  %s2364_s14 = smov (!%p33_p0, %s35_s14), %s1956_s28 }
   0xe   : > { %p503_p3 = pnand %p1671_p1, %p502_p2  ;;  %p37_p4 = scmp.ge.s32.totalorder %s2364_s14, 2 }
   0xf   : > { %p588_p5 = scmp.lt.s32.totalorder (!%p503_p3), %s1948_s26, 1  ;;  %p592_p6 = scmp.lt.s32.totalorder (!%p503_p3), %s1944_s25, 1 }
  0x10   : > { %s2366_s14 = smov (%p37_p4, %s2364_s14), 0  ;;  %506 = sbr.rel (%p503_p3) target bundleno = 2612 (0xa34), region = 72 }
  0x11   : > { %2339 = sst [smem:[#allocation9_spill]] %s2366_s14  ;;  %s2340_s0 = sld [smem:[#allocation10_spill]] (!%p503_p3) }
  0x12   : > { %s2341_s1 = sld [smem:[#allocation11_spill]] (!%p503_p3)  ;;  %s2342_s3 = sld [smem:[#allocation12_spill]] (!%p503_p3) }
  0x13   : > { %s2343_s7 = sld [smem:[#allocation13_spill]] (!%p503_p3)  ;;  %s2345_s22 = sld [smem:[#allocation15_spill]] (!%p503_p3) }
  0x14   : > { %s2346_s30 = sld [smem:[#allocation16_spill]] (!%p503_p3) }
  0x17   : > { %s2368_s26 = smov (!%p588_p5, %s1948_s26), 1 }
  0x18   : > { %s2082_s15 = scalar_select %p592_p6, %s1944_s25, 1 }
  0x19   : > { %s1672_s16 = sshll.u32 %s2368_s26, 3  ;;  %s2347_s25 = sld [smem:[#allocation4_spill]] }
  0x1a   : > { %s591_s19 = scalar_lea.vmem %s2340_s0, %s1672_s16  ;;  %s1716_s20 = sshll.u32 %s2082_s15, 4 }
  0x1b   : > { %s596_s23 = scalar_lea.vmem %s2341_s1, %s1716_s20  ;;  %s2098_s29 = scalar_lea.vmem %s2342_s3, %s1716_s20 }
  0x1c   : > { %s2115_s24 = scalar_lea.vmem %s2343_s7, %s1716_s20  ;;  %s1719_s3 = sshll.u32 %s2082_s15, 5 }
  0x1d   : > { %s629_s13 = scalar_lea.vmem %s2319_s10, %s2082_s15  ;;  %s2129_s0 = scalar_lea.vmem %s2318_s9, %s1719_s3 }
  0x1e   : > { %s632_s1 = scalar_lea.vmem %s2320_s11, %s2082_s15  ;;  %s635_s7 = scalar_lea.vmem %s2345_s22, %s2082_s15 }
  0x1f   : > { %s2142_s8 = scalar_lea.vmem %s2346_s30, %s1672_s16  ;;  %p1682_p7 = scmp.ne.s32.totalorder %s2347_s25, 0 }
  0x20   : > { %v645_v0 = vld [vmem:[%s591_s19] sm:$0xff] (!%p1682_p7)  ;;  %vm646_vm0 = vcmask (!%p1682_p7), 261120  }
  0x21   : > { %644 = sbr.rel (%p1682_p7) target bundleno = 40 (0x28), region = 76  ;;  %647 = vst.msk [vmem:[#allocation2] sm:$0xff] (!%p1682_p7), %vm646_vm0, %v645_v0 }
  0x28 PF: > { %v1890_v1 = vld [vmem:[%s596_s23] sm:$0xff]   ;;  %v1962_v2 = vmov 0.0   ;;  %v1891_v3 = vld [vmem:[%s596_s23 + $0x8] sm:$0xff]   ;;  %vm1963_vm1 = vmmov 0   ;;  %vm673_vm2 = vcmask 261120   ;;  %s2348_s16 = scalar_lea.vmem %s2311_s2, %s2082_s15  ;;  %s1964_s19 = smov 120   ;;  %v717_v24 = vlaneseq }
  0x29   : > { %1750 = vmatprep.subr.bf16.mxu0 %v1962_v2  ;;  %1758 = vmatprep.subr.bf16.mxu1 %v1962_v2  ;;  %v2149_v4 = vld [vmem:[#allocation2] sm:$0xff]  ;;  %s1965_s23 = smov 96   ;;  %s1966_s22 = smov 80   ;;  %vm726_vm3 = vcmask 64512   ;;  %vm792_vm5 = vcmask 1043456   ;;  %vm953_vm6 = vcmask 130112  }
  0x2a   : > { %1751 = vmatpush3.bf16.msra.mxu0 %v1890_v1  ;;  %1754 = vmatprep.mubr.msk.bf16.mxu0 %vm1963_vm1, %v1962_v2  ;;  %v649_v5 = vpack.c.bf16 %v2149_v4, %v2149_v4  ;;  %v1683_v6 = vld [vmem:[%s2348_s16] ss:$0 sm:$0xff]  ;;  %s1967_s26 = smov 88   ;;  %s1968_s17 = smov 72   ;;  %v718_v25 = vshrl.u32 %v717_v24, 7  ;;  %v720_v26 = vand.u32 127, %v717_v24 }
  0x2b   : > { %1752 = vmatprep.subr.bf16.mxu0 %v1962_v2  ;;  %1760 = vmatprep.mubr.msk.bf16.mxu1 %vm1963_vm1, %v1962_v2  ;;  %s1969_s18 = smov 112   ;;  %s1970_s12 = smov 104   ;;  %vm1071_vm7 = vcmask 195712   ;;  %vm1189_vm8 = vcmask 261312   ;;  %vm1403_vm9 = vcmask 523264  }
  0x2c   : > { %vm721_vm4 = vcmp.ge.s32.totalorder %v718_v25, %v720_v26  ;;  %s1971_s21 = smov 56   ;;  %s1972_s20 = smov 64  }
  0x2d   : > { %s1973_s14 = smov 40   ;;  %s1974_s27 = smov 48  }
  0x2e   : > { %1753 = vmatpush3.bf16.msra.mxu0 %v1891_v3  ;;  %s1975_s28 = smov 8   ;;  %s1976_s25 = smov 16  }
  0x2f   : > { %1764 = vmatprep.subr.bf16.mxu0 %v1962_v2  ;;  %s1977_s3 = smov 24   ;;  %s2349_s16 = scalar_lea.vmem %s2313_s4, %s2082_s15 }
  0x31   : > { %1755 = vmatmul.mubr.msk.bf16.vlgmr.msra.gmra.mrb[0].mxu0 %vm673_vm2, %v649_v5 }
  0x32   : > { %1766 = vmatprep.mubr.msk.bf16.mxu0 %vm1963_vm1, %v1962_v2 }
 0x104   : > { %v711_v7 = vpop.f32.mrb[0].mxu0 }
 0x105   : > { %v712_v8 = vadd.f32 %v1683_v6, %v711_v7  ;;  %v1756_v9 = vpop.f32.mrb[1].mxu0 }
 0x106   : > { %v714_v10 = vpop.f32.mrb[2].mxu0 }
 0x107   : > { %v2165_v11 = vpack.c.bf16 %v712_v8, %v712_v8  ;;  %v1757_v12 = vpop.f32.mrb[3].mxu0 }
 0x109   : > { %837 = vrot.lane.b32.xlu1 %v2165_v11, %s1964_s19  ;;  %724 = vrot.lane.b32.xlu0 %v2165_v11, %s1965_s23 }
 0x10d   : > { %957 = vrot.lane.b32.xlu1 %v2165_v11, %s1966_s22  ;;  %839 = vrot.lane.b32.xlu0 %v2165_v11, %s1967_s26  ;;  %s2350_s22 = scalar_lea.vmem %s2314_s5, %s2082_s15 }
 0x111   : > { %1075 = vrot.lane.b32.xlu1 %v2165_v11, %s1968_s17  ;;  %955 = vrot.lane.b32.xlu0 %v2165_v11, %s1969_s18  ;;  %s2351_s18 = scalar_lea.vmem %s2315_s6, %s2082_s15 }
 0x115   : > { %1073 = vrot.lane.b32.xlu0 %v2165_v11, %s1970_s12 }
 0x17b   : > { %v725_v13 = vpop.permute.xlu0 %724  ;;  %v838_v16 = vpop.permute.xlu1 %837 }
 0x17c   : > { %v731_v14 = vsel %vm726_vm3, %v725_v13, 0 }
 0x17d   : > { %1759 = vmatpush3.bf16.xpose.msra.mxu1 %v731_v14 }
 0x17e   : > { %1770 = vmatprep.subr.bf16.mxu1 %v1962_v2 }
 0x17f   : > { %v840_v15 = vpop.permute.xlu0 %839  ;;  %v958_v18 = vpop.permute.xlu1 %957 }
 0x180   : > { %v845_v17 = vsel %vm726_vm3, %v840_v15, 0  ;;  %v963_v19 = vsel %vm726_vm3, %v958_v18, 0 }
 0x183   : > { %v1076_v20 = vpop.permute.xlu1 %1075  ;;  %v956_v21 = vpop.permute.xlu0 %955 }
 0x184   : > { %1761 = vmatmul.mubr.msk.bf16.vlgmr.msra.gmra.mrb[0].mxu1 %vm726_vm3, %v2165_v11  ;;  %v1081_v22 = vsel %vm726_vm3, %v1076_v20, 0 }
 0x185   : > { %1771 = vmatpush3.bf16.xpose.msra.mxu1 %v845_v17  ;;  %1772 = vmatprep.mubr.msk.bf16.mxu1 %vm1963_vm1, %v1962_v2 }
 0x186   : > { %1782 = vmatprep.subr.bf16.mxu1 %v1962_v2 }
 0x187   : > { %v1074_v23 = vpop.permute.xlu0 %1073 }
 0x18c   : > { %1773 = vmatmul.mubr.msk.bf16.vlgmr.msra.gmra.mrb[4].mxu1 %vm726_vm3, %v838_v16 }
 0x18d   : > { %1783 = vmatpush3.bf16.xpose.msra.mxu1 %v963_v19  ;;  %1784 = vmatprep.mubr.msk.bf16.mxu1 %vm1963_vm1, %v1962_v2 }
 0x18e   : > { %1794 = vmatprep.subr.bf16.mxu1 %v1962_v2 }
 0x194   : > { %1785 = vmatmul.mubr.msk.bf16.vlgmr.msra.gmra.mrb[8].mxu1 %vm726_vm3, %v956_v21 }
 0x195   : > { %1795 = vmatpush3.bf16.xpose.msra.mxu1 %v1081_v22  ;;  %1796 = vmatprep.mubr.msk.bf16.mxu1 %vm1963_vm1, %v1962_v2 }
 0x196   : > { %1806 = vmatprep.subr.bf16.mxu1 %v1962_v2 }
 0x19c   : > { %1797 = vmatmul.mubr.msk.bf16.vlgmr.msra.gmra.mrb[12].mxu1 %vm726_vm3, %v1074_v23 }
 0x19d   : > { %1810 = vmatprep.mubr.msk.bf16.mxu1 %vm1963_vm1, %v1962_v2 }
 0x257   : > { %v767_v27 = vpop.f32.mrb[0].mxu1 }
 0x258   : > { %v773_v28 = vmul.f32 0.35355338, %v767_v27  ;;  %v1762_v29 = vpop.f32.mrb[1].mxu1 }
 0x259   : > { %v770_v30 = vpop.f32.mrb[2].mxu1 }
 0x25a   : > { %v1763_v31 = vpop.f32.mrb[3].mxu1  ;;  %v774_v32 = vsel %vm721_vm4, %v773_v28, -1e+09 }
 0x25b   : > { %v775_v33 = vsel %vm726_vm3, %v774_v32, -inf }
 0x25c   : > { %776 = vmax.xlane.f32.xlu1 %v775_v33 }
 0x25f   : > { %v881_v34 = vpop.f32.mrb[4].mxu1 }
 0x260   : > { %v887_v35 = vmul.f32 0.35355338, %v881_v34  ;;  %v1774_v36 = vpop.f32.mrb[5].mxu1 }
 0x261   : > { %v884_v37 = vpop.f32.mrb[6].mxu1 }
 0x262   : > { %v1775_v38 = vpop.f32.mrb[7].mxu1  ;;  %v888_v39 = vsel %vm721_vm4, %v887_v35, -1e+09 }
 0x263   : > { %v889_v40 = vsel %vm726_vm3, %v888_v39, -inf }
 0x264   : > { %890 = vmax.xlane.f32.xlu0 %v889_v40 }
 0x267   : > { %v999_v41 = vpop.f32.mrb[8].mxu1 }
 0x268   : > { %v1005_v42 = vmul.f32 0.35355338, %v999_v41  ;;  %v1786_v43 = vpop.f32.mrb[9].mxu1 }
 0x269   : > { %v1002_v44 = vpop.f32.mrb[10].mxu1 }
 0x26a   : > { %v1787_v45 = vpop.f32.mrb[11].mxu1  ;;  %v1006_v46 = vsel %vm721_vm4, %v1005_v42, -1e+09 }
 0x26b   : > { %v1007_v47 = vsel %vm726_vm3, %v1006_v46, -inf  ;;  %v1892_v45 = vld [vmem:[%s2098_s29] sm:$0xff]  }
 0x26c   : > { %1008 = vmax.xlane.f32.xlu0 %v1007_v47  ;;  %1807 = vmatpush3.bf16.msra.mxu1 %v1892_v45 }
 0x26d   : > { %1808 = vmatprep.subr.bf16.mxu1 %v1962_v2 }
 0x26f   : > { %v1117_v48 = vpop.f32.mrb[12].mxu1 }
 0x270   : > { %v1123_v49 = vmul.f32 0.35355338, %v1117_v48  ;;  %v1798_v50 = vpop.f32.mrb[13].mxu1 }
 0x271   : > { %v1120_v51 = vpop.f32.mrb[14].mxu1 }
 0x272   : > { %v1799_v52 = vpop.f32.mrb[15].mxu1  ;;  %v1124_v53 = vsel %vm721_vm4, %v1123_v49, -1e+09 }
 0x273   : > { %v1125_v54 = vsel %vm726_vm3, %v1124_v53, -inf }
 0x274   : > { %1126 = vmax.xlane.f32.xlu1 %v1125_v54 }
 0x2e9   : > { %v777_v55 = vpop.xlane.xlu1 %776 }
 0x2ea   : > { %v778_v56 = vsub.f32 %v774_v32, %v777_v55 }
 0x2ec   : > { %v779_v57 = vmul.f32 1.442695, %v778_v56 }
 0x2ee   : > { %1900 = vpow2.f32 %v779_v57 }
 0x2f1   : > { %v891_v58 = vpop.xlane.xlu0 %890 }
 0x2f2   : > { %v892_v59 = vsub.f32 %v888_v39, %v891_v58 }
 0x2f4   : > { %v893_v60 = vmul.f32 1.442695, %v892_v59 }
 0x2f6   : > { %1902 = vpow2.f32 %v893_v60  ;;  %v1695_v60 = vld [vmem:[%s2349_s16] ss:$0 sm:$0xff] }
 0x2f8   : > { %v1901_v61 = vpop.eup %1900 }
 0x2f9   : > { %v1009_v62 = vpop.xlane.xlu0 %1008  ;;  %v781_v63 = vsel %vm726_vm3, %v1901_v61, 0.0 }
 0x2fa   : > { %v1010_v0 = vsub.f32 %v1006_v46, %v1009_v62  ;;  %782 = vadd.xlane.f32.xlu0 %v781_v63  ;;  %v1893_v46 = vld [vmem:[%s2098_s29 + $0x8] sm:$0xff]   ;;  %s2355_s29 = sld [smem:[#allocation4_spill]] }
 0x2fb   : > { %1809 = vmatpush3.bf16.msra.mxu1 %v1893_v46 }
 0x2fc   : > { %v1011_v1 = vmul.f32 1.442695, %v1010_v0  ;;  %1822 = vmatprep.subr.bf16.mxu1 %v1962_v2 }
 0x2fe   : > { %1904 = vpow2.f32 %v1011_v1 }
 0x300   : > { %v1903_v3 = vpop.eup %1902  ;;  %p1713_p8 = scmp.ne.s32.totalorder %s2355_s29, 1 }
 0x301   : > { %v895_v5 = vsel %vm726_vm3, %v1903_v3, 0.0  ;;  %v1127_v8 = vpop.xlane.xlu1 %1126 }
 0x302   : > { %896 = vadd.xlane.f32.xlu1 %v895_v5  ;;  %v1128_v9 = vsub.f32 %v1124_v53, %v1127_v8 }
 0x304   : > { %v1129_v10 = vmul.f32 1.442695, %v1128_v9 }
 0x306   : > { %1906 = vpow2.f32 %v1129_v10 }
 0x308   : > { %v1905_v6 = vpop.eup %1904 }
 0x309   : > { %v1013_v7 = vsel %vm726_vm3, %v1905_v6, 0.0 }
 0x30a   : > { %1014 = vadd.xlane.f32.xlu0 %v1013_v7 }
 0x310   : > { %v1907_v12 = vpop.eup %1906 }
 0x311   : > { %v1131_v13 = vsel %vm726_vm3, %v1907_v12, 0.0 }
 0x313   : > { %901 = vrot.lane.b32.xlu1 %v2165_v11, %s1971_s21  ;;  %s2352_s21 = sld [smem:[#allocation14_spill]] }
 0x320   : > { %787 = vrot.lane.b32.xlu0 %v2165_v11, %s1972_s20  ;;  %s2353_s20 = scalar_lea.vmem %s2352_s21, %s2082_s15 }
 0x324   : > { %1137 = vrot.lane.b32.xlu0 %v2165_v11, %s1973_s14 }
 0x337   : > { %1132 = vadd.xlane.f32.xlu1 %v1131_v13  ;;  %v1895_v13 = vld [vmem:[%s2115_s24 + $0x8] sm:$0xff]  }
 0x348   : > { %1019 = vrot.lane.b32.xlu1 %v2165_v11, %s1974_s27 }
 0x387   : > { %v783_v14 = vpop.xlane.xlu0 %782 }
 0x388   : > { %1908 = vrcp.f32 %v783_v14 }
 0x38f   : > { %v897_v15 = vpop.xlane.xlu1 %896 }
 0x390   : > { %1910 = vrcp.f32 %v897_v15 }
 0x392   : > { %v1909_v16 = vpop.eup %1908 }
 0x393   : > { %v785_v18 = vmul.f32 %v1909_v16, %v1901_v61  ;;  %v902_v21 = vpop.permute.xlu1 %901 }
 0x394   : > { %v907_v24 = vsel %vm792_vm5, %v902_v21, 0 }
 0x395   : > { %v786_v22 = vpack.c.bf16 %v785_v18, %v785_v18 }
 0x397   : > { %v1015_v17 = vpop.xlane.xlu0 %1014 }
 0x398   : > { %1912 = vrcp.f32 %v1015_v17  ;;  %v1699_v17 = vld [vmem:[%s2350_s22] ss:$0 sm:$0xff] }
 0x39a   : > { %v1911_v23 = vpop.eup %1910 }
 0x39b   : > { %v788_v19 = vpop.permute.xlu0 %787  ;;  %v899_v11 = vmul.f32 %v1911_v23, %v1903_v3  ;;  %v1896_v23 = vld [vmem:[%s2129_s0] sm:$0xff]  }
 0x39c   : > { %v794_v20 = vsel %vm792_vm5, %v788_v19, 0  ;;  %v1700_v19 = vld [vmem:[%s2351_s18] ss:$0 sm:$0xff] }
 0x39d   : > { %1765 = vmatpush3.bf16.msra.mxu0 %v794_v20  ;;  %v900_v25 = vpack.c.bf16 %v899_v11, %v899_v11  ;;  %v1898_v11 = vld [vmem:[%s2129_s0 + $0x10] sm:$0xff]  }
 0x39e   : > { %1776 = vmatprep.subr.bf16.mxu0 %v1962_v2 }
 0x39f   : > { %v1138_v31 = vpop.permute.xlu0 %1137 }
 0x3a0   : > { %1767 = vmatmul.mubr.msk.bf16.vlgmr.msra.gmra.mrb[4].mxu0 %vm726_vm3, %v786_v22  ;;  %v1143_v33 = vsel %vm792_vm5, %v1138_v31, 0 }
 0x3a1   : > { %1777 = vmatpush3.bf16.msra.mxu0 %v907_v24  ;;  %1778 = vmatprep.mubr.msk.bf16.mxu0 %vm1963_vm1, %v1962_v2  ;;  %v1897_v24 = vld [vmem:[%s2129_s0 + $0x8] sm:$0xff]  }
 0x3a2   : > { %1788 = vmatprep.subr.bf16.mxu0 %v1962_v2  ;;  %v1913_v26 = vpop.eup %1912 }
 0x3a3   : > { %v1017_v28 = vmul.f32 %v1913_v26, %v1905_v6  ;;  %v1701_v26 = vld [vmem:[%s2353_s20] ss:$0 sm:$0xff] }
 0x3a5   : > { %v1018_v32 = vpack.c.bf16 %v1017_v28, %v1017_v28 }
 0x3a8   : > { %1779 = vmatmul.mubr.msk.bf16.vlgmr.msra.gmra.mrb[8].mxu0 %vm726_vm3, %v900_v25  ;;  %v1899_v25 = vld [vmem:[%s2129_s0 + $0x18] sm:$0xff]  }
 0x3a9   : > { %1790 = vmatprep.mubr.msk.bf16.mxu0 %vm1963_vm1, %v1962_v2 }
 0x3c4   : > { %v1133_v27 = vpop.xlane.xlu1 %1132 }
 0x3c5   : > { %1914 = vrcp.f32 %v1133_v27 }
 0x3c8   : > { %v1020_v29 = vpop.permute.xlu1 %1019 }
 0x3c9   : > { %v1025_v30 = vsel %vm792_vm5, %v1020_v29, 0 }
 0x3ca   : > { %1789 = vmatpush3.bf16.msra.mxu0 %v1025_v30 }
 0x3cb   : > { %1800 = vmatprep.subr.bf16.mxu0 %v1962_v2 }
 0x3cd   : > { %1791 = vmatmul.mubr.msk.bf16.vlgmr.msra.gmra.mrb[12].mxu0 %vm726_vm3, %v1018_v32 }
 0x3ce   : > { %1801 = vmatpush3.bf16.msra.mxu0 %v1143_v33  ;;  %1802 = vmatprep.mubr.msk.bf16.mxu0 %vm1963_vm1, %v1962_v2 }
 0x3cf   : > { %v1915_v34 = vpop.eup %1914  ;;  %1814 = vmatprep.subr.bf16.mxu0 %v1962_v2 }
 0x3d0   : > { %v1135_v35 = vmul.f32 %v1915_v34, %v1907_v12  ;;  %v1894_v12 = vld [vmem:[%s2115_s24] sm:$0xff]  }
 0x3d2   : > { %v1136_v36 = vpack.c.bf16 %v1135_v35, %v1135_v35 }
 0x3d5   : > { %1803 = vmatmul.mubr.msk.bf16.vlgmr.msra.gmra.mrb[16].mxu0 %vm726_vm3, %v1136_v36 }
 0x3d6   : > { %1818 = vmatprep.mubr.msk.bf16.mxu0 %vm1963_vm1, %v1962_v2  ;;  %1815 = vmatpush3.bf16.msra.mxu0 %v1894_v12 }
 0x3d7   : > { %1816 = vmatprep.subr.bf16.mxu0 %v1962_v2 }
 0x3da   : > { %1817 = vmatpush3.bf16.msra.mxu0 %v1895_v13 }
 0x473   : > { %v830_v37 = vpop.f32.mrb[4].mxu0 }
 0x474   : > { %836 = vst.msk [vmem:[#allocation3] sm:$0xff] %vm726_vm3, %v830_v37  ;;  %v1768_v38 = vpop.f32.mrb[5].mxu0  ;;  %v1705_v37 = vld [vmem:[%s629_s13] ss:$0 sm:$0xff] }
 0x475   : > { %v833_v39 = vpop.f32.mrb[6].mxu0 }
 0x476   : > { %v1769_v40 = vpop.f32.mrb[7].mxu0 }
 0x47b   : > { %v943_v41 = vpop.f32.mrb[8].mxu0 }
 0x47c   : > { %950 = vrot.lane.b32.xlu1 %v943_v41, %s1975_s28  ;;  %v1780_v42 = vpop.f32.mrb[9].mxu0 }
 0x47d   : > { %v946_v43 = vpop.f32.mrb[10].mxu0 }
 0x47e   : > { %v1781_v44 = vpop.f32.mrb[11].mxu0 }
 0x4a0   : > { %v1061_v47 = vpop.f32.mrb[12].mxu0 }
 0x4a1   : > { %1068 = vrot.lane.b32.xlu0 %v1061_v47, %s1976_s25  ;;  %v1792_v48 = vpop.f32.mrb[13].mxu0 }
 0x4a2   : > { %v1064_v49 = vpop.f32.mrb[14].mxu0 }
 0x4a3   : > { %v1793_v50 = vpop.f32.mrb[15].mxu0 }
 0x4a8   : > { %v1179_v51 = vpop.f32.mrb[16].mxu0 }
 0x4a9   : > { %1186 = vrot.lane.b32.xlu1 %v1179_v51, %s1977_s3  ;;  %v1804_v52 = vpop.f32.mrb[17].mxu0 }
 0x4aa   : > { %v1182_v53 = vpop.f32.mrb[18].mxu0 }
 0x4ab   : > { %v1805_v54 = vpop.f32.mrb[19].mxu0 }
 0x4ac   : > { %v1711_v54 = vld [vmem:[%s632_s1] ss:$0 sm:$0xff] }
 0x4ee   : > { %v951_v55 = vpop.permute.xlu1 %950 }
 0x4ef   : > { %954 = vst.msk [vmem:[#allocation3] sm:$0xff] %vm953_vm6, %v951_v55 }
 0x513   : > { %v1069_v56 = vpop.permute.xlu0 %1068 }
 0x514   : > { %1072 = vst.msk [vmem:[#allocation3] sm:$0xff] %vm1071_vm7, %v1069_v56  ;;  %v1712_v56 = vld [vmem:[%s635_s7] ss:$0 sm:$0xff] }
 0x51b   : > { %v1187_v57 = vpop.permute.xlu1 %1186 }
 0x51c   : > { %1190 = vst.msk [vmem:[#allocation3] sm:$0xff] %vm1189_vm8, %v1187_v57 }
 0x523   : > { %v1191_v58 = vld [vmem:[#allocation3] sm:$0xff] }
 0x524   : > { %v1192_v59 = vpack.c.bf16 %v1191_v58, %v1191_v58 }
 0x526   : > { %1811 = vmatmul.mubr.msk.bf16.vlgmr.msra.gmra.mrb[16].mxu1 %vm673_vm2, %v1192_v59 }
 0x527   : > { %1830 = vmatprep.mubr.msk.bf16.mxu1 %vm1963_vm1, %v1962_v2  ;;  %1823 = vmatpush3.bf16.msra.mxu1 %v1896_v23 }
 0x528   : > { %1824 = vmatprep.subr.bf16.mxu1 %v1962_v2 }
 0x52b   : > { %1825 = vmatpush3.bf16.msra.mxu1 %v1897_v24 }
 0x52c   : > { %1826 = vmatprep.subr.bf16.mxu1 %v1962_v2 }
 0x52f   : > { %1827 = vmatpush3.bf16.msra.mxu1 %v1898_v11 }
 0x530   : > { %1828 = vmatprep.subr.bf16.mxu1 %v1962_v2 }
 0x533   : > { %1829 = vmatpush3.bf16.msra.mxu1 %v1899_v25 }
 0x5f9   : > { %v1253_v61 = vpop.f32.mrb[16].mxu1 }
 0x5fa   : > { %v1254_v62 = vadd.f32 %v1695_v60, %v1253_v61  ;;  %v1812_v63 = vpop.f32.mrb[17].mxu1 }
 0x5fb   : > { %v1256_v0 = vpop.f32.mrb[18].mxu1 }
 0x5fc   : > { %v1813_v1 = vpop.f32.mrb[19].mxu1  ;;  %v1259_v3 = vadd.f32 %v1254_v62, %v2149_v4 }
 0x5fe   : > { %v1262_v5 = vsel %vm673_vm2, %v1259_v3, 0.0 }
 0x5ff   : > { %1263 = vadd.xlane.f32.xlu0 %v1262_v5 }
 0x68c   : > { %v1264_v6 = vpop.xlane.xlu0 %1263 }
 0x68d   : > { %v1266_v7 = vmul.f32 0.03125, %v1264_v6 }
 0x68f   : > { %v1267_v8 = vsub.f32 %v1259_v3, %v1266_v7 }
 0x691   : > { %v1268_v9 = vmul.f32 %v1267_v8, %v1267_v8 }
 0x693   : > { %v1269_v10 = vsel %vm673_vm2, %v1268_v9, 0.0 }
 0x694   : > { %1270 = vadd.xlane.f32.xlu1 %v1269_v10 }
 0x721   : > { %v1271_v4 = vpop.xlane.xlu1 %1270 }
 0x722   : > { %v1272_v14 = vmul.f32 0.03125, %v1271_v4 }
 0x724   : > { %v1273_v15 = vadd.f32 1e-05, %v1272_v14 }
 0x726   : > { %1916 = vrsqrt.f32 %v1273_v15 }
 0x730   : > { %v1917_v16 = vpop.eup %1916 }
 0x731   : > { %v1275_v18 = vmul.f32 %v1917_v16, %v1267_v8 }
 0x733   : > { %v1282_v20 = vmul.f32 %v1699_v17, %v1275_v18 }
 0x735   : > { %v1289_v21 = vadd.f32 %v1700_v19, %v1282_v20 }
 0x737   : > { %v1290_v22 = vpack.c.bf16 %v1289_v21, %v1289_v21 }
 0x739   : > { %1819 = vmatmul.mubr.msk.bf16.vlgmr.msra.gmra.mrb[20].mxu0 %vm673_vm2, %v1290_v22 }
 0x80c   : > { %v1351_v27 = vpop.f32.mrb[20].mxu0 }
 0x80d   : > { %v1352_v28 = vadd.f32 %v1701_v26, %v1351_v27  ;;  %v1820_v29 = vpop.f32.mrb[21].mxu0 }
 0x80e   : > { %v1354_v30 = vpop.f32.mrb[22].mxu0 }
 0x80f   : > { %v1359_v31 = vmul.f32 0.70710677, %v1352_v28  ;;  %v1821_v32 = vpop.f32.mrb[23].mxu0  ;;  %v1357_v34 = vmul.f32 0.5, %v1352_v28 }
 0x811   : > { %1918 = verf.f32 %v1359_v31 }
 0x81b   : > { %v1919_v33 = vpop.eup %1918 }
 0x81c   : > { %v1361_v35 = vadd.f32 1.0, %v1919_v33 }
 0x81e   : > { %v1362_v36 = vmul.f32 %v1361_v35, %v1357_v34 }
 0x820   : > { %v1363_v2 = vpack.c.bf16 %v1362_v36, %v1362_v36 }
 0x822   : > { %1831 = vmatmul.mubr.msk.bf16.vlgmr.msra.gmra.mrb[20].mxu1 %vm1403_vm9, %v1363_v2 }
 0x8f5   : > { %v1441_v38 = vpop.f32.mrb[20].mxu1 }
 0x8f6   : > { %v1442_v39 = vadd.f32 %v1705_v37, %v1441_v38  ;;  %v1832_v40 = vpop.f32.mrb[21].mxu1 }
 0x8f7   : > { %v1444_v41 = vpop.f32.mrb[22].mxu1 }
 0x8f8   : > { %v1833_v42 = vpop.f32.mrb[23].mxu1  ;;  %v1447_v43 = vadd.f32 %v1442_v39, %v1289_v21 }
 0x8fa   : > { %v1450_v44 = vsel %vm673_vm2, %v1447_v43, 0.0 }
 0x8fb   : > { %1451 = vadd.xlane.f32.xlu0 %v1450_v44 }
 0x988   : > { %v1452_v45 = vpop.xlane.xlu0 %1451 }
 0x989   : > { %v1453_v46 = vmul.f32 0.03125, %v1452_v45 }
 0x98b   : > { %v1454_v47 = vsub.f32 %v1447_v43, %v1453_v46 }
 0x98d   : > { %v1455_v48 = vmul.f32 %v1454_v47, %v1454_v47 }
 0x98f   : > { %v1456_v49 = vsel %vm673_vm2, %v1455_v48, 0.0 }
 0x990   : > { %1457 = vadd.xlane.f32.xlu0 %v1456_v49 }
 0xa1d   : > { %v1458_v50 = vpop.xlane.xlu0 %1457 }
 0xa1e   : > { %v1459_v51 = vmul.f32 0.03125, %v1458_v50 }
 0xa20   : > { %v1460_v52 = vadd.f32 1e-05, %v1459_v51 }
 0xa22   : > { %1920 = vrsqrt.f32 %v1460_v52 }
 0xa2c   : > { %v1921_v53 = vpop.eup %1920 }
 0xa2d   : > { %v1462_v55 = vmul.f32 %v1921_v53, %v1454_v47  ;;  %1481 = sbr.rel (%p1713_p8) target bundleno = 2612 (0xa34), region = 80 }
 0xa2f   : > { %v1469_v57 = vmul.f32 %v1711_v54, %v1462_v55 }
 0xa31   : > { %v1476_v58 = vadd.f32 %v1712_v56, %v1469_v57 }
 0xa33   : > { %1477 = vst.msk [vmem:[#allocation2] sm:$0xff] %vm673_vm2, %v1476_v58  ;;  %1482 = vst.msk [vmem:[%s2142_s8] sm:$0xff] (!%p1713_p8), %vm673_vm2, %v1476_v58 }
 0xa34 PF: > { %s2356_s30 = sld [smem:[#allocation7_spill]]  ;;  %s2357_s25 = sld [smem:[#allocation5_spill]] }
 0xa35   : > { %s2358_s26 = sld [smem:[#allocation6_spill]]  ;;  %s2359_s27 = sld [smem:[#allocation8_spill]] }
 0xa36   : > { %s2360_s28 = sld [smem:[#allocation9_spill]] }
 0xa3a   : > { %s23_s29 = sadd.s32 1, %s2356_s30  }
 0xa3b   : > { %p20_p9 = scmp.ge.s32.totalorder %s23_s29, 6  }
 0xa3d   :  { %22 = sbr.rel (!%p20_p9) target bundleno = 8 (0x8), region = 146 }

</bundles_post_ra>
